<compile_context>
chip_gen: v7x
topology: tpu7x:2x2x1
jax: 0.10.0
libtpu: 0.0.40
codegen_flags: <defaults>
</compile_context>

<pallas_src>
import functools

import jax
import jax.numpy as jnp
from jax.experimental import pallas as pl
from jax.experimental.pallas import tpu as pltpu


# ----------------------------------------------------------------------------
# Small static helpers
# ----------------------------------------------------------------------------
_TK_TARGET = 2304  # K tile (multiple of 256); ~1.1 MiB per (256, tk) bf16 tile


def _round_up(x, m):
    return ((x + m - 1) // m) * m


def _choose_k_tiling(K):
    """Pick a K tile size (multiple of 128) and the padded K extent."""
    if K <= _TK_TARGET:
        tk = _round_up(K, 128)
        return tk, tk
    return _TK_TARGET, _round_up(K, _TK_TARGET)


def _m_tiling(M):
    """Pick an M tile (sublane-aligned) and padded M; >=2 tiles when M>=512
    so v7x's two TensorCores both get work on the big layers."""
    tm = 256 if M >= 256 else _round_up(M, 8)
    return tm, _round_up(M, tm)


# ----------------------------------------------------------------------------
# Pallas kernel 1: fused  out = act( (X @ W) * scale + shift )
#   grid = (M tiles [parallel], K tiles [arbitrary]); f32 VMEM accumulator.
#   X: (tm, tk) bf16   W: (tk, Cpad) bf16   scale/shift: (1, Cpad) f32
# ----------------------------------------------------------------------------
def _mm_bn_act_kernel(x_ref, w_ref, scale_ref, shift_ref, o_ref, acc_ref, *, relu):
    k = pl.program_id(1)

    @pl.when(k == 0)
    def _():
        acc_ref[...] = jnp.zeros_like(acc_ref)

    acc_ref[...] += jnp.dot(x_ref[...], w_ref[...],
                            preferred_element_type=jnp.float32)

    @pl.when(k == pl.num_programs(1) - 1)
    def _():
        out = acc_ref[...] * scale_ref[...] + shift_ref[...]
        if relu:
            out = jnp.maximum(out, 0.0)
        o_ref[...] = out.astype(o_ref.dtype)


# ----------------------------------------------------------------------------
# Pallas kernel 2: fused final block
#   h   = relu( (X @ W1) * scale + shift )      (3x3 conv + BN + ReLU, 128->64)
#   out = h @ W2 + b2                           (1x1 conv, 64 -> num_classes)
# Both the 64-wide hidden and the num_classes-wide output are 128-lane padded;
# the hidden never leaves VMEM.
# ----------------------------------------------------------------------------
def _final_fused_kernel(x_ref, w1_ref, scale_ref, shift_ref, w2_ref, b2_ref,
                        o_ref, acc_ref):
    k = pl.program_id(1)

    @pl.when(k == 0)
    def _():
        acc_ref[...] = jnp.zeros_like(acc_ref)

    acc_ref[...] += jnp.dot(x_ref[...], w1_ref[...],
                            preferred_element_type=jnp.float32)

    @pl.when(k == pl.num_programs(1) - 1)
    def _():
        h = jnp.maximum(acc_ref[...] * scale_ref[...] + shift_ref[...], 0.0)
        out = jnp.dot(h.astype(jnp.bfloat16), w2_ref[...],
                      preferred_element_type=jnp.float32) + b2_ref[...]
        o_ref[...] = out.astype(o_ref.dtype)


# ----------------------------------------------------------------------------
# pallas_call wrappers
# ----------------------------------------------------------------------------
def matmul_bn_act(x2d, prep, *, relu=True):
    """x2d: (M, K) f32 activations; prep holds padded bf16 weights + f32 BN."""
    M, K = x2d.shape
    tk, K_pad, C_pad = prep["tk"], prep["k_pad"], prep["c_pad"]
    tm, M_pad = _m_tiling(M)
    xp = jnp.pad(x2d, ((0, M_pad - M), (0, K_pad - K))).astype(jnp.bfloat16)

    out = pl.pallas_call(
        functools.partial(_mm_bn_act_kernel, relu=relu),
        out_shape=jax.ShapeDtypeStruct((M_pad, C_pad), jnp.float32),
        grid=(M_pad // tm, K_pad // tk),
        in_specs=[
            pl.BlockSpec((tm, tk), lambda i, k: (i, k)),
            pl.BlockSpec((tk, C_pad), lambda i, k: (k, 0)),
            pl.BlockSpec((1, C_pad), lambda i, k: (0, 0)),
            pl.BlockSpec((1, C_pad), lambda i, k: (0, 0)),
        ],
        out_specs=pl.BlockSpec((tm, C_pad), lambda i, k: (i, 0)),
        scratch_shapes=[pltpu.VMEM((tm, C_pad), jnp.float32)],
        compiler_params=pltpu.CompilerParams(
            dimension_semantics=("parallel", "arbitrary")),
    )(xp, prep["w"], prep["scale"], prep["shift"])
    return out[:M, :prep["cout"]]


def final_block_and_classifier(x_nhwc, prep_fb, prep_cls):
    """Fused: conv3x3(128->64)+BN+ReLU, then conv1x1(64->num_classes)."""
    N, H, W, _ = x_nhwc.shape
    a = _im2col_3x3(x_nhwc)
    M, K = a.shape
    tk, K_pad, Cmid_pad = prep_fb["tk"], prep_fb["k_pad"], prep_fb["c_pad"]
    C2_pad = prep_cls["c_pad"]
    tm, M_pad = _m_tiling(M)
    ap = jnp.pad(a, ((0, M_pad - M), (0, K_pad - K))).astype(jnp.bfloat16)

    out = pl.pallas_call(
        _final_fused_kernel,
        out_shape=jax.ShapeDtypeStruct((M_pad, C2_pad), jnp.float32),
        grid=(M_pad // tm, K_pad // tk),
        in_specs=[
            pl.BlockSpec((tm, tk), lambda i, k: (i, k)),
            pl.BlockSpec((tk, Cmid_pad), lambda i, k: (k, 0)),
            pl.BlockSpec((1, Cmid_pad), lambda i, k: (0, 0)),
            pl.BlockSpec((1, Cmid_pad), lambda i, k: (0, 0)),
            pl.BlockSpec((Cmid_pad, C2_pad), lambda i, k: (0, 0)),
            pl.BlockSpec((1, C2_pad), lambda i, k: (0, 0)),
        ],
        out_specs=pl.BlockSpec((tm, C2_pad), lambda i, k: (i, 0)),
        scratch_shapes=[pltpu.VMEM((tm, Cmid_pad), jnp.float32)],
        compiler_params=pltpu.CompilerParams(
            dimension_semantics=("parallel", "arbitrary")),
    )(ap, prep_fb["w"], prep_fb["scale"], prep_fb["shift"],
      prep_cls["w"], prep_cls["b"])
    return out[:M, :prep_cls["cout"]].reshape(N, H, W, prep_cls["cout"])


# ----------------------------------------------------------------------------
# JAX glue (im2col, bilinear upsample) — layout plumbing, not compute
# ----------------------------------------------------------------------------
def _im2col_3x3(x_nhwc):
    # TODO(synk): im2col + channel concat still round-trip 9x the activation
    # volume through HBM; at real feature-map sizes move the 9-tap / concat
    # accumulation into the kernel's K loop instead.
    N, H, W, Cin = x_nhwc.shape
    xp = jnp.pad(x_nhwc, ((0, 0), (1, 1), (1, 1), (0, 0)))
    cols = jnp.concatenate(
        [xp[:, dy:dy + H, dx:dx + W, :] for dy in range(3) for dx in range(3)],
        axis=-1)
    return cols.reshape(N * H * W, 9 * Cin)


def conv3x3_bn_relu(x_nhwc, prep):
    N, H, W, _ = x_nhwc.shape
    a = _im2col_3x3(x_nhwc)
    out = matmul_bn_act(a, prep, relu=True)
    # Dropout2d is identity in eval mode.
    return out.reshape(N, H, W, prep["cout"])


def _interp_matrix(out_size, in_size):
    """Row-interpolation matrix for bilinear, align_corners=True."""
    if in_size == 1:
        return jnp.ones((out_size, 1), jnp.float32)
    denom = max(out_size - 1, 1)
    src = jnp.arange(out_size, dtype=jnp.float32) * (in_size - 1) / denom
    lo = jnp.clip(jnp.floor(src).astype(jnp.int32), 0, in_size - 2)
    frac = src - lo.astype(jnp.float32)
    rows = jnp.arange(out_size)
    m = jnp.zeros((out_size, in_size), jnp.float32)
    m = m.at[rows, lo].add(1.0 - frac)
    m = m.at[rows, lo + 1].add(frac)
    return m


def upsample_bilinear_align_corners(x_nhwc, out_h, out_w):
    mh = _interp_matrix(out_h, x_nhwc.shape[1])
    mw = _interp_matrix(out_w, x_nhwc.shape[2])
    x = jnp.einsum("ph,nhwc->npwc", mh, x_nhwc)
    x = jnp.einsum("qw,npwc->npqc", mw, x)
    return x


# ----------------------------------------------------------------------------
# One-time parameter preparation: BN fold, reshape, pad, bf16 cast.
# ----------------------------------------------------------------------------
def prepare_conv_bn(w, conv_b, gamma, beta, run_mean, run_var, eps=1e-5):
    """w: (3,3,Cin,Cout) f32 -> padded bf16 (K_pad, C_pad) matrix + f32 BN."""
    kh, kw, cin, cout = w.shape
    K = kh * kw * cin
    tk, K_pad = _choose_k_tiling(K)
    C_pad = _round_up(cout, 128)
    wm = jnp.pad(w.reshape(K, cout),
                 ((0, K_pad - K), (0, C_pad - cout))).astype(jnp.bfloat16)
    scale = gamma / jnp.sqrt(run_var + eps)
    shift = beta + (conv_b - run_mean) * scale
    scale = jnp.pad(scale, (0, C_pad - cout), constant_values=1.0)
    shift = jnp.pad(shift, (0, C_pad - cout))
    return dict(w=wm,
                scale=scale.reshape(1, C_pad).astype(jnp.float32),
                shift=shift.reshape(1, C_pad).astype(jnp.float32),
                tk=tk, k_pad=K_pad, cout=cout, c_pad=C_pad)


def prepare_conv1x1(w, b, k_pad):
    """w: (Cin, Cout) f32 -> padded bf16 (k_pad, C_pad); b padded f32."""
    cin, cout = w.shape
    C_pad = _round_up(cout, 128)
    wm = jnp.pad(w, ((0, k_pad - cin), (0, C_pad - cout))).astype(jnp.bfloat16)
    bb = jnp.pad(b, (0, C_pad - cout)).reshape(1, C_pad).astype(jnp.float32)
    return dict(w=wm, b=bb, cout=cout, c_pad=C_pad)


def prepare_params(raw):
    prep = {
        "block1": prepare_conv_bn(*raw["block1"]),
        "block2": prepare_conv_bn(*raw["block2"]),
        "block3": prepare_conv_bn(*raw["block3"]),
        "final_block": prepare_conv_bn(*raw["final_block"]),
    }
    prep["final_cls"] = prepare_conv1x1(
        raw["final_w"], raw["final_b"], prep["final_block"]["c_pad"])
    return prep


# ----------------------------------------------------------------------------
# FCNDecoder forward (eval mode).
# ----------------------------------------------------------------------------
def fcn_decoder_forward(features_nchw, prep):
    x1, x2, x3, x4, x5 = features_nchw  # NCHW, like the PyTorch module
    to_nhwc = lambda t: jnp.transpose(t, (0, 2, 3, 1))
    x3n, x4n, x5n = to_nhwc(x3), to_nhwc(x4), to_nhwc(x5)

    x = conv3x3_bn_relu(x5n, prep["block1"])
    x = upsample_bilinear_align_corners(x, x4.shape[2], x4.shape[3])
    x = jnp.concatenate([x, x4n], axis=-1)

    x = conv3x3_bn_relu(x, prep["block2"])
    x = upsample_bilinear_align_corners(x, x3.shape[2], x3.shape[3])
    x = jnp.concatenate([x, x3n], axis=-1)

    x = conv3x3_bn_relu(x, prep["block3"])
    x = upsample_bilinear_align_corners(x, x1.shape[2], x1.shape[3])

    x = final_block_and_classifier(x, prep["final_block"], prep["final_cls"])
    return jnp.transpose(x, (0, 3, 1, 2))  # back to NCHW


# ----------------------------------------------------------------------------
# Deterministic synthetic parameters (no checkpoint).
# ----------------------------------------------------------------------------
def make_conv_bn_params(key, cin, cout):
    kw, kb = jax.random.split(key)
    w = jax.random.normal(kw, (3, 3, cin, cout), jnp.float32) * 0.05
    b = jax.random.normal(kb, (cout,), jnp.float32) * 0.02
    gamma = jnp.ones((cout,), jnp.float32)
    beta = jnp.zeros((cout,), jnp.float32)
    run_mean = jnp.zeros((cout,), jnp.float32)
    run_var = jnp.ones((cout,), jnp.float32)
    return (w, b, gamma, beta, run_mean, run_var)


def make_params(num_classes, key):
    ks = jax.random.split(key, 6)
    return {
        "block1": make_conv_bn_params(ks[0], 512, 512),
        "block2": make_conv_bn_params(ks[1], 512 + 512, 256),
        "block3": make_conv_bn_params(ks[2], 256 + 256, 128),
        "final_block": make_conv_bn_params(ks[3], 128, 64),
        "final_w": jax.random.normal(ks[4], (64, num_classes), jnp.float32) * 0.05,
        "final_b": jax.random.normal(ks[5], (num_classes,), jnp.float32) * 0.02,
    }


if __name__ == "__main__":
    key = jax.random.PRNGKey(0)
    num_classes = 5

    # Small feature pyramid (NCHW, PyTorch convention). Channel counts of
    # x3/x4/x5 are fixed by the module definition; spatial sizes kept small.
    k1, k2, k3, k4, k5, kp = jax.random.split(key, 6)
    x1 = jax.random.normal(k1, (2, 64, 16, 16), jnp.float32)
    x2 = jax.random.normal(k2, (2, 128, 8, 8), jnp.float32)   # unused by forward
    x3 = jax.random.normal(k3, (2, 256, 8, 8), jnp.float32)
    x4 = jax.random.normal(k4, (2, 512, 4, 4), jnp.float32)
    x5 = jax.random.normal(k5, (2, 512, 2, 2), jnp.float32)

    raw_params = make_params(num_classes, kp)
    prep = prepare_params(raw_params)   # BN fold + padding + bf16 cast, once

    out = fcn_decoder_forward([x1, x2, x3, x4, x5], prep)
    out = jax.block_until_ready(out)

    assert out.shape == (2, num_classes, 16, 16), out.shape
    assert bool(jnp.all(jnp.isfinite(out)))
    # TODO(synk): Dropout2d train-mode stochastic channel masking not modeled
    # (eval-mode identity used, matching module.eval() semantics).
    print("KERNEL_OK")
</pallas_src>

<mosaic_0001>
module attributes {stable_mosaic.version = 11 : i64} {
  func.func @_mm_bn_act_kernel(%arg0: i32, %arg1: i32, %arg2: memref<8x2304xbf16, #tpu.memory_space<vmem>>, %arg3: memref<2304x512xbf16, #tpu.memory_space<vmem>>, %arg4: memref<1x512xf32, #tpu.memory_space<vmem>>, %arg5: memref<1x512xf32, #tpu.memory_space<vmem>>, %arg6: memref<8x512xf32, #tpu.memory_space<vmem>>, %arg7: memref<8x512xf32, #tpu.memory_space<vmem>>) attributes {dimension_semantics = [#tpu.dimension_semantics<parallel>, #tpu.dimension_semantics<arbitrary>], iteration_bounds = array<i64: 1, 2>, scalar_prefetch = 0 : i64, scratch_operands = 1 : i64, tpu.core_type = #tpu.core_type<tc>, window_params = [{transform_indices = @transform_0, window_bounds = array<i64: 8, 2304>}, {transform_indices = @transform_1, window_bounds = array<i64: 2304, 512>}, {pipeline_mode = #tpu.pipeline_mode<synchronous>, transform_indices = @transform_2, window_bounds = array<i64: 1, 512>}, {pipeline_mode = #tpu.pipeline_mode<synchronous>, transform_indices = @transform_3, window_bounds = array<i64: 1, 512>}, {transform_indices = @transform_4, window_bounds = array<i64: 8, 512>}]} {
    %c0_i32 = arith.constant 0 : i32
    %0 = arith.cmpi eq, %arg1, %c0_i32 : i32
    %1 = arith.extui %0 : i1 to i32
    %c0_i32_0 = arith.constant 0 : i32
    %2 = arith.cmpi ne, %1, %c0_i32_0 : i32
    scf.if %2 {
      %cst_9 = arith.constant 0.000000e+00 : f32
      %12 = vector.broadcast %cst_9 : f32 to vector<8x512xf32>
      %c0_10 = arith.constant 0 : index
      %c0_11 = arith.constant 0 : index
      %13 = vector.load %arg7[%c0_10, %c0_11] : memref<8x512xf32, #tpu.memory_space<vmem>>, vector<8x512xf32>
      tpu.vector_store %arg7[%c0_10, %c0_11], %12 {strides = array<i32>} : memref<8x512xf32, #tpu.memory_space<vmem>>, vector<8x512xf32>,
    } else {
    }
    %c0 = arith.constant 0 : index
    %c0_1 = arith.constant 0 : index
    %3 = vector.load %arg7[%c0, %c0_1] : memref<8x512xf32, #tpu.memory_space<vmem>>, vector<8x512xf32>
    %c0_2 = arith.constant 0 : index
    %c0_3 = arith.constant 0 : index
    %4 = vector.load %arg2[%c0_2, %c0_3] : memref<8x2304xbf16, #tpu.memory_space<vmem>>, vector<8x2304xbf16>
    %c0_4 = arith.constant 0 : index
    %c0_5 = arith.constant 0 : index
    %5 = vector.load %arg3[%c0_4, %c0_5] : memref<2304x512xbf16, #tpu.memory_space<vmem>>, vector<2304x512xbf16>
    %cst = arith.constant dense<0.000000e+00> : vector<8x512xf32>
    %6 = tpu.matmul %4, %5, %cst {dimension_numbers = #tpu.dot_dimension_numbers<[1], [0], [0], [1], [0, 0, 1, 1], [], []>} : vector<8x2304xbf16>, vector<2304x512xbf16>, vector<8x512xf32> -> vector<8x512xf32>
    %7 = arith.addf %3, %6 : vector<8x512xf32>
    %c0_6 = arith.constant 0 : index
    %c0_7 = arith.constant 0 : index
    %8 = vector.load %arg7[%c0_6, %c0_7] : memref<8x512xf32, #tpu.memory_space<vmem>>, vector<8x512xf32>
    tpu.vector_store %arg7[%c0_6, %c0_7], %7 {strides = array<i32>} : memref<8x512xf32, #tpu.memory_space<vmem>>, vector<8x512xf32>,
    %c1_i32 = arith.constant 1 : i32
    %9 = arith.cmpi eq, %arg1, %c1_i32 : i32
    %10 = arith.extui %9 : i1 to i32
    %c0_i32_8 = arith.constant 0 : i32
    %11 = arith.cmpi ne, %10, %c0_i32_8 : i32
    scf.if %11 {
      %c0_9 = arith.constant 0 : index
      %c0_10 = arith.constant 0 : index
      %12 = vector.load %arg7[%c0_9, %c0_10] : memref<8x512xf32, #tpu.memory_space<vmem>>, vector<8x512xf32>
      %c0_11 = arith.constant 0 : index
      %c0_12 = arith.constant 0 : index
      %13 = vector.load %arg4[%c0_11, %c0_12] : memref<1x512xf32, #tpu.memory_space<vmem>>, vector<1x512xf32>
      %14 = vector.broadcast %13 : vector<1x512xf32> to vector<8x512xf32>
      %15 = arith.mulf %12, %14 : vector<8x512xf32>
      %c0_13 = arith.constant 0 : index
      %c0_14 = arith.constant 0 : index
      %16 = vector.load %arg5[%c0_13, %c0_14] : memref<1x512xf32, #tpu.memory_space<vmem>>, vector<1x512xf32>
      %17 = vector.broadcast %16 : vector<1x512xf32> to vector<8x512xf32>
      %18 = arith.addf %15, %17 : vector<8x512xf32>
      %cst_15 = arith.constant 0.000000e+00 : f32
      %19 = vector.broadcast %cst_15 : f32 to vector<8x512xf32>
      %20 = arith.maximumf %18, %19 : vector<8x512xf32>
      %c0_16 = arith.constant 0 : index
      %c0_17 = arith.constant 0 : index
      %21 = vector.load %arg6[%c0_16, %c0_17] : memref<8x512xf32, #tpu.memory_space<vmem>>, vector<8x512xf32>
      tpu.vector_store %arg6[%c0_16, %c0_17], %20 {strides = array<i32>} : memref<8x512xf32, #tpu.memory_space<vmem>>, vector<8x512xf32>,
    } else {
    }
    return
  }
  func.func @transform_0(%arg0: i32, %arg1: i32) -> (i32, i32) {
    %c0_i32 = arith.constant 0 : i32
    return %arg0, %arg1 : i32, i32
  }
  func.func @transform_1(%arg0: i32, %arg1: i32) -> (i32, i32) {
    %c0_i32 = arith.constant 0 : i32
    %c0_i32_0 = arith.constant 0 : i32
    return %arg1, %c0_i32 : i32, i32
  }
  func.func @transform_2(%arg0: i32, %arg1: i32) -> (i32, i32) {
    %c0_i32 = arith.constant 0 : i32
    %c0_i32_0 = arith.constant 0 : i32
    %c0_i32_1 = arith.constant 0 : i32
    return %c0_i32, %c0_i32_0 : i32, i32
  }
  func.func @transform_3(%arg0: i32, %arg1: i32) -> (i32, i32) {
    %c0_i32 = arith.constant 0 : i32
    %c0_i32_0 = arith.constant 0 : i32
    %c0_i32_1 = arith.constant 0 : i32
    return %c0_i32, %c0_i32_0 : i32, i32
  }
  func.func @transform_4(%arg0: i32, %arg1: i32) -> (i32, i32) {
    %c0_i32 = arith.constant 0 : i32
    %c0_i32_0 = arith.constant 0 : i32
    return %arg0, %c0_i32 : i32, i32
  }
}

</mosaic_0001>

<bundles_post_ra>
// kernel: tpu_custom_call.1
= control target key start
LH: loop header
LB: loop body
LE: loop exit
PB: predicated region body
PF: predicated region fallthrough
CT: control target
= control target key end

     0   :  { %9 = vsyncpa [#allocation4], 0  ;;  %s7587_s0 = inlined_call_operand.hbm [shape: bf16[8,4608], index: 0, kind: input, shape index: {}]   ;;  %s7588_s1 = inlined_call_operand.hbm [shape: bf16[4608,512], index: 1, kind: input, shape index: {}]   ;;  %s7589_s2 = inlined_call_operand.hbm [shape: f32[1,512], index: 2, kind: input, shape index: {}]   ;;  %s7590_s3 = inlined_call_operand.hbm [shape: f32[1,512], index: 3, kind: input, shape index: {}]   ;;  %s7591_s4 = inlined_call_operand.hbm [shape: f32[8,512], index: 4, kind: output, shape index: {}]  }
   0x1   :  { %11 = vsyncpa [#allocation4 + $0x1], 0 }
   0x2   :  { %12 = vsyncpa [#allocation7], 0 }
   0x3   :  { %14 = vsyncpa [#allocation7 + $0x1], 0 }
   0x4   :  { %15 = vsyncpa [#allocation10], 0 }
   0x5   :  { %16 = vsyncpa [#allocation5], 0  ;;  %s6596_s15 = smov 0   ;;  %s6598_s16 = smov 0  }
   0x6   :  { %s6600_s17 = smov 0   ;;  %s6602_s18 = smov 0  }
   0x7   :  { %s6604_s19 = smov 0   ;;  %s6606_s20 = smov 0  }
   0x8 LB: > { %s6625_s21 = sadd.s32 4294967295, %s6561_s20   ;;  %p56_p0 = scmp.ne.s32.totalorder %s6545_s16, %s6541_s15  ;;  %s6561_s20 = sphi %s6606_s20, %s22_s20   ;;  %s6557_s19 = sphi %s6604_s19, %s7609_s19   ;;  %s6553_s18 = sphi %s6602_s18, %s7608_s18   ;;  %s6549_s17 = sphi %s6600_s17, %s7607_s17   ;;  %s6545_s16 = sphi %s6598_s16, %s7606_s16   ;;  %s6541_s15 = sphi %s6596_s15, %s7605_s15  }
   0x9   : > { %p7592_p1 = scmp.eq.s32.totalorder %s6625_s21, 0  ;;  %p4762_p2 = scmp.ge.s32.totalorder %s6561_s20, 1 }
   0xa   : > { %p161_p3 = scmp.lt.s32.totalorder %s6561_s20, 3  ;;  %s6563_s24 = smov [#allocation8]  }
   0xb   : > { %p6633_p4 = por %p7592_p1, %p56_p0  ;;  %s174_s25 = sshll.u32 %s6563_s24, 4  ;;  %s175_s25 = int_to_ptr.vmem [resolvable:$true] %s174_s25 }
   0xc   : > { %p6637_p5 = pnand %p4762_p2, %p161_p3  ;;  %s6564_s26 = smov [#allocation9]  }
   0xd   : > { %s7595_s22 = scalar_select %p6633_p4, 1, 0 }
   0xe   : > { %s7596_s23 = scalar_select %p6637_p5, 1, 0 }
   0xf   : > { %p5396_p6 = pneg %p6637_p5  ;;  %s185_s27 = sshll.u32 %s6564_s26, 4  ;;  %s6649_s27 = int_to_ptr.vmem [resolvable:$true] %s185_s27 }
  0x10   : > { %s6353_s5 = scalar_lea.hbm %s7589_s2, 64 }
  0x11   : > { %p6645_p7 = pnand %p5396_p6, %p7592_p1  ;;  %p6354_p8 = scmp.ne.s32.totalorder %s7589_s2, %s6353_s5 }
  0x12   : > { %p6360_p12 = scmp.lt.u32.totalorder %s6353_s5, %s7589_s2 }
  0x13   : > { %p6355_p9 = pneg %p6645_p7 }
  0x15   : > { %p6356_p10 = pnand %p6355_p9, %p6354_p8 }
  0x17   : > { %p6357_p11 = pneg %p6356_p10 }
  0x19   : > { %p6362_p13 = pnand %p6360_p12, %p6357_p11 }
  0x1b   : > { %6365 = shalt.err (!%p6362_p13)
}
  0x1c   : > { %s6366_s10 = scalar_lea.vmem %s175_s25, 64  ;;  %p6374_p6 = scmp.lt.s32.totalorder %s175_s25, %s175_s25 }
  0x1d   : > { %p6367_p0 = scmp.ne.s32.totalorder %s175_s25, %s6366_s10  ;;  %p6375_p1 = scmp.lt.s32.totalorder %s6366_s10, %s6366_s10 }
  0x1f   : > { %p6369_p2 = pnand %p6367_p0, %p6355_p9  ;;  %p6376_p4 = por %p6375_p1, %p6374_p6 }
  0x21   : > { %p6370_p3 = pneg %p6369_p2 }
  0x23   : > { %p6377_p5 = pnand %p6376_p4, %p6370_p3 }
  0x25   : > { %6380 = shalt.err (!%p6377_p5)
}
  0x26   : > { %5399 = dma.hbm_to_vmem [thread:$0]  (!%p6645_p7), %s7589_s2, 64, %s175_s25, [#allocation7]  }
  0x27   : > { %s6381_s15 = scalar_lea.hbm %s7590_s3, 64 }
  0x28   : > { %p6382_p8 = scmp.ne.s32.totalorder %s7590_s3, %s6381_s15  ;;  %p6388_p5 = scmp.lt.u32.totalorder %s6381_s15, %s7590_s3 }
  0x2a   : > { %p6384_p1 = pnand %p6382_p8, %p6355_p9 }
  0x2c   : > { %p6385_p4 = pneg %p6384_p1 }
  0x2e   : > { %p6390_p10 = pnand %p6388_p5, %p6385_p4 }
  0x30   : > { %6393 = shalt.err (!%p6390_p10)
}
  0x31   : > { %s6394_s25 = scalar_lea.vmem %s6649_s27, 64  ;;  %p6402_p0 = scmp.lt.s32.totalorder %s6649_s27, %s6649_s27 }
  0x32   : > { %p6395_p11 = scmp.ne.s32.totalorder %s6649_s27, %s6394_s25  ;;  %p6403_p2 = scmp.lt.s32.totalorder %s6394_s25, %s6394_s25 }
  0x34   : > { %p6397_p12 = pnand %p6395_p11, %p6355_p9  ;;  %p6404_p3 = por %p6403_p2, %p6402_p0 }
  0x36   : > { %p6398_p13 = pneg %p6397_p12 }
  0x38   : > { %p6405_p6 = pnand %p6404_p3, %p6398_p13 }
  0x3a   : > { %6408 = shalt.err (!%p6405_p6)
}
  0x3b   : > { %5402 = dma.hbm_to_vmem [thread:$0]  (!%p6645_p7), %s7590_s3, 64, %s6649_s27, [#allocation10]  }
  0x3c   : > { %s31_s7 = sadd.s32 1, %s6557_s19  ;;  %s43_s8 = sadd.s32 1, %s6549_s17 }
  0x3d   : > { %p32_p9 = scmp.ge.s32.totalorder %s31_s7, 2  ;;  %p50_p8 = scmp.ne.s32.totalorder %s6549_s17, %s6545_s16 }
  0x3e   : > { %p51_p1 = scmp.eq.s32.totalorder %s6561_s20, 0  ;;  %p5412_p4 = scmp.lt.s32.totalorder %s6561_s20, 2 }
  0x3f   : > { %s7611_s7 = smov (%p32_p9, %s31_s7), 0  ;;  %s6707_s28 = sand.u32 1, %s6549_s17  }
  0x40   : > { %p52_p5 = por %p51_p1, %p50_p8  ;;  %s39_s9 = ssub.s32 %s6557_s19, %s7611_s7 }
  0x41   : > { %p41_p10 = scmp.eq.s32.totalorder %s39_s9, 0  ;;  %s5376_s10 = smul.u32 72, %s6707_s28 }
  0x42   : > { %s5372_s11 = smul.u32 1152, %s6557_s19  ;;  %p6713_p7 = pnand %p5412_p4, %p52_p5 }
  0x43   : > { %s6718_s12 = scalar_select %p41_p10, %s6549_s17, %s43_s8  }
  0x44   : > { %s6723_s15 = scalar_lea.hbm %s7587_s0, %s5372_s11  ;;  %s200_s24 = scalar_lea.vmem [#allocation3], %s5376_s10 }
  0x45   : > { %s210_s26 = sshll.u32 %s200_s24, 4  ;;  %s5377_s29 = smul.u32 4608, %s6707_s28  ;;  %s6725_s26 = int_to_ptr.vmem [resolvable:$true] %s210_s26 }
  0x46   : > { %s197_s30 = scalar_lea.sflag [#allocation4], %s6707_s28  ;;  %s6409_s25 = scalar_lea.hbm %s6723_s15, 1152 }
  0x47   : > { %p6410_p11 = scmp.ne.s32.totalorder %s6723_s15, %s6409_s25  ;;  %p6411_p12 = pneg %p6713_p7 }
  0x48   : > { %s6414_s8 = scalar_lea.hbm %s7587_s0, 2304  ;;  %p6415_p2 = scmp.lt.u32.totalorder %s6723_s15, %s7587_s0 }
  0x49   : > { %p6412_p13 = pnand %p6411_p12, %p6410_p11  ;;  %p6416_p3 = scmp.lt.u32.totalorder %s6414_s8, %s6409_s25 }
  0x4a   : > { %p6418_p9 = scmp.lt.u32.totalorder %s6409_s25, %s6723_s15 }
  0x4b   : > { %p6413_p0 = pneg %p6412_p13  ;;  %p6417_p6 = por %p6416_p3, %p6415_p2 }
  0x4d   : > { %p6419_p8 = por %p6418_p9, %p6417_p6 }
  0x4f   : > { %p6420_p1 = pnand %p6419_p8, %p6413_p0 }
  0x51   : > { %6423 = shalt.err (!%p6420_p1)
}
  0x52   : > { %s6424_s10 = scalar_lea.vmem %s6725_s26, 1152  ;;  %s6565_s13 = smov [#allocation3]  }
  0x53   : > { %p6425_p4 = scmp.ne.s32.totalorder %s6725_s26, %s6424_s10  ;;  %s6429_s14 = sshll.u32 %s6565_s13, 4  ;;  %s6430_s14 = int_to_ptr.vmem [resolvable:$false] %s6429_s14 }
  0x54   : > { %s6431_s24 = scalar_lea.vmem %s6430_s14, 2304  ;;  %p6432_p11 = scmp.lt.s32.totalorder %s6725_s26, %s6430_s14 }
  0x55   : > { %p6427_p5 = pnand %p6425_p4, %p6411_p12  ;;  %p6433_p13 = scmp.lt.s32.totalorder %s6431_s24, %s6424_s10 }
  0x57   : > { %p6428_p10 = pneg %p6427_p5  ;;  %p6434_p2 = por %p6433_p13, %p6432_p11 }
  0x59   : > { %p6435_p3 = pnand %p6434_p2, %p6428_p10 }
  0x5b   : > { %6438 = shalt.err (!%p6435_p3)
}
  0x5c   : > { %5406 = dma.hbm_to_vmem [thread:$0]  (!%p6713_p7), %s6723_s15, 1152, %s6725_s26, %s197_s30  }
  0x5d   : > { %s5375_s25 = smul.u32 73728, %s6557_s19  ;;  %s221_s5 = scalar_lea.vmem [#allocation6], %s5377_s29 }
  0x5e   : > { %s229_s6 = sshll.u32 %s221_s5, 4  ;;  %s217_s8 = sand.u32 1, %s6561_s20   ;;  %s6758_s6 = int_to_ptr.vmem [resolvable:$true] %s229_s6 }
  0x5f   : > { %s6763_s10 = scalar_lea.hbm %s7588_s1, %s5375_s25  ;;  %s6765_s13 = scalar_lea.sflag [#allocation7], %s217_s8 }
  0x60   : > { %s6439_s14 = scalar_lea.hbm %s6763_s10, 73728  ;;  %s6444_s26 = scalar_lea.hbm %s7588_s1, 147456 }
  0x61   : > { %p6440_p0 = scmp.ne.s32.totalorder %s6763_s10, %s6439_s14  ;;  %p6445_p8 = scmp.lt.u32.totalorder %s6763_s10, %s7588_s1 }
  0x62   : > { %p6446_p1 = scmp.lt.u32.totalorder %s6444_s26, %s6439_s14  ;;  %p6448_p5 = scmp.lt.u32.totalorder %s6439_s14, %s6763_s10 }
  0x63   : > { %p6442_p6 = pnand %p6440_p0, %p6411_p12 }
  0x64   : > { %p6447_p4 = por %p6446_p1, %p6445_p8 }
  0x65   : > { %p6443_p9 = pneg %p6442_p6 }
  0x66   : > { %p6449_p10 = por %p6448_p5, %p6447_p4 }
  0x68   : > { %p6450_p11 = pnand %p6449_p10, %p6443_p9 }
  0x6a   : > { %6453 = shalt.err (!%p6450_p11)
}
  0x6b   : > { %s6454_s24 = scalar_lea.vmem %s6758_s6, 73728  ;;  %s6566_s25 = smov [#allocation6]  }
  0x6c   : > { %p6455_p13 = scmp.ne.s32.totalorder %s6758_s6, %s6454_s24  ;;  %s6459_s5 = sshll.u32 %s6566_s25, 4  ;;  %s6460_s5 = int_to_ptr.vmem [resolvable:$false] %s6459_s5 }
  0x6d   : > { %s6461_s8 = scalar_lea.vmem %s6460_s5, 147456  ;;  %p6462_p0 = scmp.lt.s32.totalorder %s6758_s6, %s6460_s5 }
  0x6e   : > { %p6457_p2 = pnand %p6455_p13, %p6411_p12  ;;  %p6463_p6 = scmp.lt.s32.totalorder %s6461_s8, %s6454_s24 }
  0x70   : > { %p6458_p3 = pneg %p6457_p2  ;;  %p6464_p8 = por %p6463_p6, %p6462_p0 }
  0x72   : > { %p6465_p1 = pnand %p6464_p8, %p6458_p3 }
  0x74   : > { %6468 = shalt.err (!%p6465_p1)
}
  0x75   : > { %s6567_s9 = smov 256   ;;  %s6568_s11 = smov 16  }
  0x76   : > { %5409 = dma.hbm_to_vmem [thread:$0]  (!%p6713_p7), %s6763_s10, 73728, %s6758_s6, %s6765_s13, %s6567_s9, %s6567_s9, %s6568_s11  }
  0x77   : > { %p7599_p12 = scmp.ne.s32.totalorder %s7596_s23, 0 }
  0x78   : > { %s243_s14 = sand.u32 (!%p7599_p12), 1, %s6545_s16   ;;  %p7600_p9 = scmp.ne.s32.totalorder (!%p7599_p12), %s7595_s22, 0 }
  0x79   : > { %241 = sbr.rel (%p7599_p12) target bundleno = 985 (0x3d9), region = 36  ;;  %s244_s15 = scalar_lea.sflag (!%p7599_p12), [#allocation4], %s243_s14 }
  0x7a   : > { %s5378_s28 = smul.u32 (!%p7599_p12), 72, %s243_s14 }
  0x7c   : > { %s6794_s26 = scalar_lea.vmem (!%p7599_p12), [#allocation3], %s5378_s28 }
  0x80   : > { %6520 = dma.done.wait (%p7600_p9), %s244_s15, 1152  }
  0x81   : > { %6522 = vsyncadd (%p7600_p9), %s244_s15, 4294966144  ;;  %s252_s29 = sand.u32 1, %s6625_s21   ;;  %s5379_s27 = smul.u32 4608, %s243_s14 }
  0x82   : > { %s253_s6 = scalar_lea.sflag [#allocation7], %s252_s29 }
  0x83   : > { %s6801_s10 = scalar_lea.vmem [#allocation6], %s5379_s27 }
  0x84   : > { %6524 = dma.done.wait (%p7600_p9), %s253_s6, 73728  }
  0x85   : > { %6526 = vsyncadd (%p7600_p9), %s253_s6, 4294893568  ;;  %p7601_p7 = scmp.eq.s32.totalorder %s6625_s21, 0 }
  0x87   : > { %6528 = dma.done.wait (%p7601_p7), [#allocation7], 64   ;;  %p7602_p4 = pmov %p7601_p7 }
  0x89   : > { %6530 = vsyncadd (%p7602_p4), [#allocation7], 4294967232  ;;  %p7603_p5 = pmov %p7602_p4 }
  0x8a   : > { %p7604_p10 = pmov %p7602_p4 }
  0x8b   : > { %6532 = dma.done.wait (%p7603_p5), [#allocation10], 64  }
  0x8c   : > { %6534 = vsyncadd (%p7604_p10), [#allocation10], 4294967232  ;;  %p4772_p11 = scmp.ne.s32.totalorder %s6553_s18, 0 }
  0x8d   : > { %v6569_v0 = vmov (!%p4772_p11), 0.0  }
  0x8e   : > { %294 = sbr.rel (%p4772_p11) target bundleno = 149 (0x95), region = 56  ;;  %295 = vst [vmem:[#allocation2] sm:$0xff] (!%p4772_p11), %v6569_v0  ;;  %296 = vst [vmem:[#allocation2 + $0x8] sm:$0xff] (!%p4772_p11), %v6569_v0 }
  0x8f   : > { %297 = vst [vmem:[#allocation2 + $0x10] sm:$0xff] (!%p4772_p11), %v6569_v0  ;;  %298 = vst [vmem:[#allocation2 + $0x18] sm:$0xff] (!%p4772_p11), %v6569_v0 }
  0x95 PF: > { %v5471_v1 = vld [vmem:[%s6801_s10 + $0x4] ss:$16 sps:$4 sm:$0xff]   ;;  %v5475_v3 = vld [vmem:[%s6801_s10] ss:$16 sps:$4 sm:$0xff]   ;;  %p5367_p13 = scmp.ne.s32.totalorder %s6553_s18, 1 }
  0x96   : > { %v5473_v2 = vld [vmem:[%s6801_s10 + $0x204] ss:$16 sps:$4 sm:$0xff]   ;;  %3831 = vmatprep.subr.bf16.mxu0 %v5471_v1  ;;  %v5476_v4 = vld [vmem:[%s6801_s10 + $0x200] ss:$16 sps:$4 sm:$0xff]  }
  0x97   : > { %3872 = vmatprep.subr.bf16.mxu1 %v5473_v2  ;;  %v5477_v5 = vld [vmem:[%s6801_s10 + $0x24] ss:$16 sps:$4 sm:$0xff]   ;;  %3832 = vmatpush1.bf16.msra.mxu0 %v5475_v3  ;;  %v5481_v7 = vld [vmem:[%s6801_s10 + $0x20] ss:$16 sps:$4 sm:$0xff]  }
  0x98   : > { %3873 = vmatpush1.bf16.msra.mxu1 %v5476_v4  ;;  %v5479_v6 = vld [vmem:[%s6801_s10 + $0x224] ss:$16 sps:$4 sm:$0xff]   ;;  %3833 = vmatprep.subr.bf16.mxu0 %v5477_v5  ;;  %v5482_v8 = vld [vmem:[%s6801_s10 + $0x220] ss:$16 sps:$4 sm:$0xff]  }
  0x99   : > { %3874 = vmatprep.subr.bf16.mxu1 %v5479_v6  ;;  %v5483_v9 = vld [vmem:[%s6801_s10 + $0x44] ss:$16 sps:$4 sm:$0xff]   ;;  %v5487_v11 = vld [vmem:[%s6801_s10 + $0x40] ss:$16 sps:$4 sm:$0xff]  }
  0x9a   : > { %v5485_v10 = vld [vmem:[%s6801_s10 + $0x244] ss:$16 sps:$4 sm:$0xff]   ;;  %v5488_v12 = vld [vmem:[%s6801_s10 + $0x240] ss:$16 sps:$4 sm:$0xff]  }
  0x9b   : > { %3834 = vmatpush1.bf16.msra.mxu0 %v5481_v7  ;;  %v5489_v13 = vld [vmem:[%s6801_s10 + $0x64] ss:$16 sps:$4 sm:$0xff]   ;;  %v5493_v15 = vld [vmem:[%s6801_s10 + $0x60] ss:$16 sps:$4 sm:$0xff]  }
  0x9c   : > { %3875 = vmatpush1.bf16.msra.mxu1 %v5482_v8  ;;  %3835 = vmatprep.subr.bf16.mxu0 %v5483_v9  ;;  %v5491_v14 = vld [vmem:[%s6801_s10 + $0x264] ss:$16 sps:$4 sm:$0xff]   ;;  %v5494_v16 = vld [vmem:[%s6801_s10 + $0x260] ss:$16 sps:$4 sm:$0xff]  }
  0x9d   : > { %3876 = vmatprep.subr.bf16.mxu1 %v5485_v10  ;;  %v5495_v17 = vld [vmem:[%s6801_s10 + $0x84] ss:$16 sps:$4 sm:$0xff]   ;;  %v5499_v19 = vld [vmem:[%s6801_s10 + $0x80] ss:$16 sps:$4 sm:$0xff]  }
  0x9e   : > { %v5497_v18 = vld [vmem:[%s6801_s10 + $0x284] ss:$16 sps:$4 sm:$0xff]   ;;  %v5500_v20 = vld [vmem:[%s6801_s10 + $0x280] ss:$16 sps:$4 sm:$0xff]  }
  0x9f   : > { %3836 = vmatpush1.bf16.msra.mxu0 %v5487_v11  ;;  %v5501_v21 = vld [vmem:[%s6801_s10 + $0xa4] ss:$16 sps:$4 sm:$0xff]   ;;  %v5505_v23 = vld [vmem:[%s6801_s10 + $0xa0] ss:$16 sps:$4 sm:$0xff]  }
  0xa0   : > { %3877 = vmatpush1.bf16.msra.mxu1 %v5488_v12  ;;  %3837 = vmatprep.subr.bf16.mxu0 %v5489_v13  ;;  %v5503_v22 = vld [vmem:[%s6801_s10 + $0x2a4] ss:$16 sps:$4 sm:$0xff]   ;;  %v5506_v24 = vld [vmem:[%s6801_s10 + $0x2a0] ss:$16 sps:$4 sm:$0xff]  }
  0xa1   : > { %3878 = vmatprep.subr.bf16.mxu1 %v5491_v14  ;;  %v5507_v25 = vld [vmem:[%s6801_s10 + $0xc4] ss:$16 sps:$4 sm:$0xff]   ;;  %v5511_v27 = vld [vmem:[%s6801_s10 + $0xc0] ss:$16 sps:$4 sm:$0xff]  }
  0xa2   : > { %v5509_v26 = vld [vmem:[%s6801_s10 + $0x2c4] ss:$16 sps:$4 sm:$0xff]   ;;  %v5512_v28 = vld [vmem:[%s6801_s10 + $0x2c0] ss:$16 sps:$4 sm:$0xff]  }
  0xa3   : > { %3838 = vmatpush1.bf16.msra.mxu0 %v5493_v15  ;;  %v5513_v29 = vld [vmem:[%s6801_s10 + $0xe4] ss:$16 sps:$4 sm:$0xff]   ;;  %v5517_v31 = vld [vmem:[%s6801_s10 + $0xe0] ss:$16 sps:$4 sm:$0xff]  }
  0xa4   : > { %3879 = vmatpush1.bf16.msra.mxu1 %v5494_v16  ;;  %3839 = vmatprep.subr.bf16.mxu0 %v5495_v17  ;;  %v5515_v30 = vld [vmem:[%s6801_s10 + $0x2e4] ss:$16 sps:$4 sm:$0xff]   ;;  %v5518_v32 = vld [vmem:[%s6801_s10 + $0x2e0] ss:$16 sps:$4 sm:$0xff]  }
  0xa5   : > { %3880 = vmatprep.subr.bf16.mxu1 %v5497_v18  ;;  %v5519_v33 = vld [vmem:[%s6801_s10 + $0x104] ss:$16 sps:$4 sm:$0xff]   ;;  %v5523_v35 = vld [vmem:[%s6801_s10 + $0x100] ss:$16 sps:$4 sm:$0xff]  }
  0xa6   : > { %v5521_v34 = vld [vmem:[%s6801_s10 + $0x304] ss:$16 sps:$4 sm:$0xff]   ;;  %v5524_v36 = vld [vmem:[%s6801_s10 + $0x300] ss:$16 sps:$4 sm:$0xff]  }
  0xa7   : > { %3840 = vmatpush1.bf16.msra.mxu0 %v5499_v19  ;;  %v5525_v37 = vld [vmem:[%s6801_s10 + $0x124] ss:$16 sps:$4 sm:$0xff]   ;;  %v5529_v39 = vld [vmem:[%s6801_s10 + $0x120] ss:$16 sps:$4 sm:$0xff]  }
  0xa8   : > { %3881 = vmatpush1.bf16.msra.mxu1 %v5500_v20  ;;  %3841 = vmatprep.subr.bf16.mxu0 %v5501_v21  ;;  %v5527_v38 = vld [vmem:[%s6801_s10 + $0x324] ss:$16 sps:$4 sm:$0xff]   ;;  %v5530_v40 = vld [vmem:[%s6801_s10 + $0x320] ss:$16 sps:$4 sm:$0xff]  }
  0xa9   : > { %3882 = vmatprep.subr.bf16.mxu1 %v5503_v22  ;;  %v5531_v41 = vld [vmem:[%s6801_s10 + $0x144] ss:$16 sps:$4 sm:$0xff]   ;;  %v5535_v43 = vld [vmem:[%s6801_s10 + $0x140] ss:$16 sps:$4 sm:$0xff]  }
  0xaa   : > { %v5533_v42 = vld [vmem:[%s6801_s10 + $0x344] ss:$16 sps:$4 sm:$0xff]   ;;  %v5536_v44 = vld [vmem:[%s6801_s10 + $0x340] ss:$16 sps:$4 sm:$0xff]  }
  0xab   : > { %3842 = vmatpush1.bf16.msra.mxu0 %v5505_v23  ;;  %v5537_v45 = vld [vmem:[%s6801_s10 + $0x164] ss:$16 sps:$4 sm:$0xff]   ;;  %v5541_v50 = vld [vmem:[%s6801_s10 + $0x160] ss:$16 sps:$4 sm:$0xff]  }
  0xac   : > { %3883 = vmatpush1.bf16.msra.mxu1 %v5506_v24  ;;  %3843 = vmatprep.subr.bf16.mxu0 %v5507_v25  ;;  %v5539_v46 = vld [vmem:[%s6801_s10 + $0x364] ss:$16 sps:$4 sm:$0xff]   ;;  %v5542_v51 = vld [vmem:[%s6801_s10 + $0x360] ss:$16 sps:$4 sm:$0xff]  }
  0xad   : > { %3884 = vmatprep.subr.bf16.mxu1 %v5509_v26  ;;  %v303_v47 = vld [vmem:[%s6794_s26] sm:$0xff]  ;;  %v304_v49 = vld [vmem:[%s6794_s26 + $0x8] sm:$0xff] }
  0xae   : > { %v6863_v48 = vcombine.high %v303_v47, %v303_v47  ;;  %v6868_v52 = vcombine.high %v304_v49, %v304_v49  ;;  %v5543_v53 = vld [vmem:[%s6801_s10 + $0x184] ss:$16 sps:$4 sm:$0xff]   ;;  %v5547_v55 = vld [vmem:[%s6801_s10 + $0x180] ss:$16 sps:$4 sm:$0xff]   ;;  %v6890_v7 = vcombine.low %v303_v47, %v303_v47  ;;  %v6892_v8 = vcombine.low %v304_v49, %v304_v49 }
  0xaf   : > { %3844 = vmatpush1.bf16.msra.mxu0 %v5511_v27  ;;  %v5545_v54 = vld [vmem:[%s6801_s10 + $0x384] ss:$16 sps:$4 sm:$0xff]   ;;  %v5548_v56 = vld [vmem:[%s6801_s10 + $0x380] ss:$16 sps:$4 sm:$0xff]  }
  0xb0   : > { %3885 = vmatpush1.bf16.msra.mxu1 %v5512_v28  ;;  %3845 = vmatprep.subr.bf16.mxu0 %v5513_v29  ;;  %v5549_v57 = vld [vmem:[%s6801_s10 + $0x1a4] ss:$16 sps:$4 sm:$0xff]   ;;  %v5553_v59 = vld [vmem:[%s6801_s10 + $0x1a0] ss:$16 sps:$4 sm:$0xff]  }
  0xb1   : > { %3886 = vmatprep.subr.bf16.mxu1 %v5515_v30  ;;  %3863 = vmatprep.mubr.bf16.mxu0 %v6863_v48  ;;  %v5551_v58 = vld [vmem:[%s6801_s10 + $0x3a4] ss:$16 sps:$4 sm:$0xff]   ;;  %v5554_v60 = vld [vmem:[%s6801_s10 + $0x3a0] ss:$16 sps:$4 sm:$0xff]  }
  0xb2   : > { %3904 = vmatprep.mubr.bf16.mxu1 %v6868_v52  ;;  %v5555_v61 = vld [vmem:[%s6801_s10 + $0x1c4] ss:$16 sps:$4 sm:$0xff]   ;;  %v5559_v63 = vld [vmem:[%s6801_s10 + $0x1c0] ss:$16 sps:$4 sm:$0xff]  }
  0xb3   : > { %3846 = vmatpush1.bf16.msra.mxu0 %v5517_v31  ;;  %v5557_v62 = vld [vmem:[%s6801_s10 + $0x3c4] ss:$16 sps:$4 sm:$0xff]   ;;  %v5560_v0 = vld [vmem:[%s6801_s10 + $0x3c0] ss:$16 sps:$4 sm:$0xff]  }
  0xb4   : > { %3887 = vmatpush1.bf16.msra.mxu1 %v5518_v32  ;;  %3847 = vmatprep.subr.bf16.mxu0 %v5519_v33  ;;  %v5561_v1 = vld [vmem:[%s6801_s10 + $0x1e4] ss:$16 sps:$4 sm:$0xff]   ;;  %v5565_v3 = vld [vmem:[%s6801_s10 + $0x1e0] ss:$16 sps:$4 sm:$0xff]  }
  0xb5   : > { %3888 = vmatprep.subr.bf16.mxu1 %v5521_v34  ;;  %v5563_v2 = vld [vmem:[%s6801_s10 + $0x3e4] ss:$16 sps:$4 sm:$0xff]   ;;  %v5566_v4 = vld [vmem:[%s6801_s10 + $0x3e0] ss:$16 sps:$4 sm:$0xff]  }
  0xb6   : > { %v5573_v5 = vld [vmem:[%s6801_s10 + $0x404] ss:$16 sps:$4 sm:$0xff]   ;;  %v5571_v9 = vld [vmem:[%s6801_s10 + $0x400] ss:$16 sps:$4 sm:$0xff]  }
  0xb7   : > { %3848 = vmatpush1.bf16.msra.mxu0 %v5523_v35  ;;  %v5576_v6 = vld [vmem:[%s6801_s10 + $0x604] ss:$16 sps:$4 sm:$0xff]   ;;  %v5574_v10 = vld [vmem:[%s6801_s10 + $0x600] ss:$16 sps:$4 sm:$0xff]  }
  0xb8   : > { %3889 = vmatpush1.bf16.msra.mxu1 %v5524_v36  ;;  %3849 = vmatprep.subr.bf16.mxu0 %v5525_v37  ;;  %v5579_v11 = vld [vmem:[%s6801_s10 + $0x424] ss:$16 sps:$4 sm:$0xff]   ;;  %v5577_v13 = vld [vmem:[%s6801_s10 + $0x420] ss:$16 sps:$4 sm:$0xff]  }
  0xb9   : > { %3890 = vmatprep.subr.bf16.mxu1 %v5527_v38  ;;  %v5582_v12 = vld [vmem:[%s6801_s10 + $0x624] ss:$16 sps:$4 sm:$0xff]   ;;  %v5580_v14 = vld [vmem:[%s6801_s10 + $0x620] ss:$16 sps:$4 sm:$0xff]  }
  0xba   : > { %v5585_v15 = vld [vmem:[%s6801_s10 + $0x444] ss:$16 sps:$4 sm:$0xff]   ;;  %v5583_v17 = vld [vmem:[%s6801_s10 + $0x440] ss:$16 sps:$4 sm:$0xff]  }
  0xbb   : > { %3850 = vmatpush1.bf16.msra.mxu0 %v5529_v39  ;;  %v5588_v16 = vld [vmem:[%s6801_s10 + $0x644] ss:$16 sps:$4 sm:$0xff]   ;;  %v5586_v18 = vld [vmem:[%s6801_s10 + $0x640] ss:$16 sps:$4 sm:$0xff]  }
  0xbc   : > { %3891 = vmatpush1.bf16.msra.mxu1 %v5530_v40  ;;  %3851 = vmatprep.subr.bf16.mxu0 %v5531_v41  ;;  %v5591_v19 = vld [vmem:[%s6801_s10 + $0x464] ss:$16 sps:$4 sm:$0xff]   ;;  %v5589_v21 = vld [vmem:[%s6801_s10 + $0x460] ss:$16 sps:$4 sm:$0xff]  }
  0xbd   : > { %3892 = vmatprep.subr.bf16.mxu1 %v5533_v42  ;;  %v5594_v20 = vld [vmem:[%s6801_s10 + $0x664] ss:$16 sps:$4 sm:$0xff]   ;;  %v5592_v22 = vld [vmem:[%s6801_s10 + $0x660] ss:$16 sps:$4 sm:$0xff]  }
  0xbe   : > { %v5597_v23 = vld [vmem:[%s6801_s10 + $0x484] ss:$16 sps:$4 sm:$0xff]   ;;  %v5595_v25 = vld [vmem:[%s6801_s10 + $0x480] ss:$16 sps:$4 sm:$0xff]  }
  0xbf   : > { %3852 = vmatpush1.bf16.msra.mxu0 %v5535_v43  ;;  %v5600_v24 = vld [vmem:[%s6801_s10 + $0x684] ss:$16 sps:$4 sm:$0xff]   ;;  %v5598_v26 = vld [vmem:[%s6801_s10 + $0x680] ss:$16 sps:$4 sm:$0xff]  }
  0xc0   : > { %3893 = vmatpush1.bf16.msra.mxu1 %v5536_v44  ;;  %3853 = vmatprep.subr.bf16.mxu0 %v5537_v45  ;;  %v5603_v27 = vld [vmem:[%s6801_s10 + $0x4a4] ss:$16 sps:$4 sm:$0xff]   ;;  %v5601_v29 = vld [vmem:[%s6801_s10 + $0x4a0] ss:$16 sps:$4 sm:$0xff]  }
  0xc1   : > { %3894 = vmatprep.subr.bf16.mxu1 %v5539_v46  ;;  %v5606_v28 = vld [vmem:[%s6801_s10 + $0x6a4] ss:$16 sps:$4 sm:$0xff]   ;;  %v5604_v30 = vld [vmem:[%s6801_s10 + $0x6a0] ss:$16 sps:$4 sm:$0xff]  }
  0xc2   : > { %v5609_v31 = vld [vmem:[%s6801_s10 + $0x4c4] ss:$16 sps:$4 sm:$0xff]   ;;  %v5607_v35 = vld [vmem:[%s6801_s10 + $0x4c0] ss:$16 sps:$4 sm:$0xff]  }
  0xc3   : > { %3854 = vmatpush1.bf16.msra.mxu0 %v5541_v50  ;;  %v5612_v32 = vld [vmem:[%s6801_s10 + $0x6c4] ss:$16 sps:$4 sm:$0xff]   ;;  %v5610_v36 = vld [vmem:[%s6801_s10 + $0x6c0] ss:$16 sps:$4 sm:$0xff]  }
  0xc4   : > { %3895 = vmatpush1.bf16.msra.mxu1 %v5542_v51  ;;  %3855 = vmatprep.subr.bf16.mxu0 %v5543_v53  ;;  %v6921_v33 = vld [vmem:[%s6794_s26 + $0x10] sm:$0xff]  ;;  %v6924_v34 = vld [vmem:[%s6794_s26 + $0x18] sm:$0xff] }
  0xc5   : > { %3896 = vmatprep.subr.bf16.mxu1 %v5545_v54  ;;  %v6930_v37 = vcombine.high %v6921_v33, %v6921_v33  ;;  %v6934_v38 = vcombine.high %v6924_v34, %v6924_v34  ;;  %v5615_v39 = vld [vmem:[%s6801_s10 + $0x4e4] ss:$16 sps:$4 sm:$0xff]   ;;  %v5613_v41 = vld [vmem:[%s6801_s10 + $0x4e0] ss:$16 sps:$4 sm:$0xff]  }
  0xc6   : > { %v5618_v40 = vld [vmem:[%s6801_s10 + $0x6e4] ss:$16 sps:$4 sm:$0xff]   ;;  %v5616_v42 = vld [vmem:[%s6801_s10 + $0x6e0] ss:$16 sps:$4 sm:$0xff]  }
  0xc7   : > { %3856 = vmatpush1.bf16.msra.mxu0 %v5547_v55  ;;  %v5621_v43 = vld [vmem:[%s6801_s10 + $0x504] ss:$16 sps:$4 sm:$0xff]   ;;  %v5619_v45 = vld [vmem:[%s6801_s10 + $0x500] ss:$16 sps:$4 sm:$0xff]  }
  0xc8   : > { %3897 = vmatpush1.bf16.msra.mxu1 %v5548_v56  ;;  %3857 = vmatprep.subr.bf16.mxu0 %v5549_v57  ;;  %v5624_v44 = vld [vmem:[%s6801_s10 + $0x704] ss:$16 sps:$4 sm:$0xff]   ;;  %v5622_v46 = vld [vmem:[%s6801_s10 + $0x700] ss:$16 sps:$4 sm:$0xff]  }
  0xc9   : > { %3898 = vmatprep.subr.bf16.mxu1 %v5551_v58  ;;  %v5627_v47 = vld [vmem:[%s6801_s10 + $0x524] ss:$16 sps:$4 sm:$0xff]   ;;  %v5625_v50 = vld [vmem:[%s6801_s10 + $0x520] ss:$16 sps:$4 sm:$0xff]  }
  0xca   : > { %v5630_v49 = vld [vmem:[%s6801_s10 + $0x724] ss:$16 sps:$4 sm:$0xff]   ;;  %v5628_v51 = vld [vmem:[%s6801_s10 + $0x720] ss:$16 sps:$4 sm:$0xff]  }
  0xcb   : > { %3858 = vmatpush1.bf16.msra.mxu0 %v5553_v59  ;;  %v5633_v53 = vld [vmem:[%s6801_s10 + $0x544] ss:$16 sps:$4 sm:$0xff]   ;;  %v5631_v55 = vld [vmem:[%s6801_s10 + $0x540] ss:$16 sps:$4 sm:$0xff]  }
  0xcc   : > { %3899 = vmatpush1.bf16.msra.mxu1 %v5554_v60  ;;  %3859 = vmatprep.subr.bf16.mxu0 %v5555_v61  ;;  %v5636_v54 = vld [vmem:[%s6801_s10 + $0x744] ss:$16 sps:$4 sm:$0xff]   ;;  %v5634_v56 = vld [vmem:[%s6801_s10 + $0x740] ss:$16 sps:$4 sm:$0xff]  }
  0xcd   : > { %3900 = vmatprep.subr.bf16.mxu1 %v5557_v62  ;;  %v5639_v57 = vld [vmem:[%s6801_s10 + $0x564] ss:$16 sps:$4 sm:$0xff]   ;;  %v5637_v59 = vld [vmem:[%s6801_s10 + $0x560] ss:$16 sps:$4 sm:$0xff]  }
  0xce   : > { %v5642_v58 = vld [vmem:[%s6801_s10 + $0x764] ss:$16 sps:$4 sm:$0xff]   ;;  %v5640_v60 = vld [vmem:[%s6801_s10 + $0x760] ss:$16 sps:$4 sm:$0xff]  }
  0xcf   : > { %3860 = vmatpush1.bf16.msra.mxu0 %v5559_v63  ;;  %v5645_v61 = vld [vmem:[%s6801_s10 + $0x584] ss:$16 sps:$4 sm:$0xff]   ;;  %v5643_v63 = vld [vmem:[%s6801_s10 + $0x580] ss:$16 sps:$4 sm:$0xff]  }
  0xd0   : > { %3901 = vmatpush1.bf16.msra.mxu1 %v5560_v0  ;;  %3861 = vmatprep.subr.bf16.mxu0 %v5561_v1  ;;  %v5648_v62 = vld [vmem:[%s6801_s10 + $0x784] ss:$16 sps:$4 sm:$0xff]   ;;  %v5646_v0 = vld [vmem:[%s6801_s10 + $0x780] ss:$16 sps:$4 sm:$0xff]  }
  0xd1   : > { %3902 = vmatprep.subr.bf16.mxu1 %v5563_v2  ;;  %v5651_v1 = vld [vmem:[%s6801_s10 + $0x5a4] ss:$16 sps:$4 sm:$0xff]  }
  0xd2   : > { %v5654_v2 = vld [vmem:[%s6801_s10 + $0x7a4] ss:$16 sps:$4 sm:$0xff]  }
  0xd3   : > { %3862 = vmatpush1.bf16.msra.mxu0 %v5565_v3  ;;  %v5649_v3 = vld [vmem:[%s6801_s10 + $0x5a0] ss:$16 sps:$4 sm:$0xff]  }
  0xd4   : > { %3903 = vmatpush1.bf16.msra.mxu1 %v5566_v4  ;;  %3913 = vmatprep.subr.bf16.mxu0 %v5573_v5  ;;  %v5652_v4 = vld [vmem:[%s6801_s10 + $0x7a0] ss:$16 sps:$4 sm:$0xff]   ;;  %v5657_v5 = vld [vmem:[%s6801_s10 + $0x5c4] ss:$16 sps:$4 sm:$0xff]  }
  0xd5   : > { %3954 = vmatprep.subr.bf16.mxu1 %v5576_v6  ;;  %v5660_v6 = vld [vmem:[%s6801_s10 + $0x7c4] ss:$16 sps:$4 sm:$0xff]  }
  0xd6   : > { %3864 = vmatmul.mubr.bf16.vlgmr.msra.gmra.mrb[0].mxu0 %v6890_v7 }
  0xd7   : > { %3905 = vmatmul.mubr.bf16.vlgmr.msra.gmra.mrb[0].mxu1 %v6892_v8  ;;  %3914 = vmatpush1.bf16.msra.mxu0 %v5571_v9  ;;  %v5655_v9 = vld [vmem:[%s6801_s10 + $0x5c0] ss:$16 sps:$4 sm:$0xff]  }
  0xd8   : > { %3955 = vmatpush1.bf16.msra.mxu1 %v5574_v10  ;;  %3915 = vmatprep.subr.bf16.mxu0 %v5579_v11  ;;  %v5658_v10 = vld [vmem:[%s6801_s10 + $0x7c0] ss:$16 sps:$4 sm:$0xff]   ;;  %v5663_v11 = vld [vmem:[%s6801_s10 + $0x5e4] ss:$16 sps:$4 sm:$0xff]  }
  0xd9   : > { %3956 = vmatprep.subr.bf16.mxu1 %v5582_v12  ;;  %3945 = vmatprep.mubr.bf16.mxu0 %v6930_v37  ;;  %v5666_v12 = vld [vmem:[%s6801_s10 + $0x7e4] ss:$16 sps:$4 sm:$0xff]  }
  0xda   : > { %3986 = vmatprep.mubr.bf16.mxu1 %v6934_v38 }
  0xdb   : > { %3916 = vmatpush1.bf16.msra.mxu0 %v5577_v13  ;;  %v5661_v13 = vld [vmem:[%s6801_s10 + $0x5e0] ss:$16 sps:$4 sm:$0xff]  }
  0xdc   : > { %3957 = vmatpush1.bf16.msra.mxu1 %v5580_v14  ;;  %3917 = vmatprep.subr.bf16.mxu0 %v5585_v15  ;;  %v5664_v14 = vld [vmem:[%s6801_s10 + $0x7e0] ss:$16 sps:$4 sm:$0xff]   ;;  %v5673_v15 = vld [vmem:[%s6801_s10 + $0x804] ss:$16 sps:$4 sm:$0xff]  }
  0xdd   : > { %3958 = vmatprep.subr.bf16.mxu1 %v5588_v16  ;;  %v5676_v16 = vld [vmem:[%s6801_s10 + $0xa04] ss:$16 sps:$4 sm:$0xff]  }
  0xdf   : > { %3918 = vmatpush1.bf16.msra.mxu0 %v5583_v17  ;;  %v6978_v17 = vcombine.low %v6921_v33, %v6921_v33  ;;  %v5691_v33 = vld [vmem:[%s6801_s10 + $0x864] ss:$16 sps:$4 sm:$0xff]  }
  0xe0   : > { %3959 = vmatpush1.bf16.msra.mxu1 %v5586_v18  ;;  %3919 = vmatprep.subr.bf16.mxu0 %v5591_v19  ;;  %v6982_v18 = vcombine.low %v6924_v34, %v6924_v34  ;;  %v5671_v19 = vld [vmem:[%s6801_s10 + $0x800] ss:$16 sps:$4 sm:$0xff]   ;;  %v5694_v34 = vld [vmem:[%s6801_s10 + $0xa64] ss:$16 sps:$4 sm:$0xff]  }
  0xe1   : > { %3960 = vmatprep.subr.bf16.mxu1 %v5594_v20  ;;  %v5674_v20 = vld [vmem:[%s6801_s10 + $0xa00] ss:$16 sps:$4 sm:$0xff]  }
  0xe3   : > { %3920 = vmatpush1.bf16.msra.mxu0 %v5589_v21  ;;  %v5679_v21 = vld [vmem:[%s6801_s10 + $0x824] ss:$16 sps:$4 sm:$0xff]  }
  0xe4   : > { %3961 = vmatpush1.bf16.msra.mxu1 %v5592_v22  ;;  %3921 = vmatprep.subr.bf16.mxu0 %v5597_v23  ;;  %v5682_v22 = vld [vmem:[%s6801_s10 + $0xa24] ss:$16 sps:$4 sm:$0xff]  }
  0xe5   : > { %3962 = vmatprep.subr.bf16.mxu1 %v5600_v24  ;;  %v6989_v23 = vld [vmem:[%s6794_s26 + $0x20] sm:$0xff]  ;;  %v6992_v24 = vld [vmem:[%s6794_s26 + $0x28] sm:$0xff] }
  0xe7   : > { %3922 = vmatpush1.bf16.msra.mxu0 %v5595_v25  ;;  %v6996_v25 = vcombine.high %v6989_v23, %v6989_v23 }
  0xe8   : > { %3963 = vmatpush1.bf16.msra.mxu1 %v5598_v26  ;;  %3923 = vmatprep.subr.bf16.mxu0 %v5603_v27  ;;  %v7000_v26 = vcombine.high %v6992_v24, %v6992_v24  ;;  %v5677_v27 = vld [vmem:[%s6801_s10 + $0x820] ss:$16 sps:$4 sm:$0xff]  }
  0xe9   : > { %3964 = vmatprep.subr.bf16.mxu1 %v5606_v28  ;;  %v5680_v28 = vld [vmem:[%s6801_s10 + $0xa20] ss:$16 sps:$4 sm:$0xff]  }
  0xeb   : > { %3924 = vmatpush1.bf16.msra.mxu0 %v5601_v29  ;;  %v5685_v29 = vld [vmem:[%s6801_s10 + $0x844] ss:$16 sps:$4 sm:$0xff]  }
  0xec   : > { %3965 = vmatpush1.bf16.msra.mxu1 %v5604_v30  ;;  %3925 = vmatprep.subr.bf16.mxu0 %v5609_v31  ;;  %v5688_v30 = vld [vmem:[%s6801_s10 + $0xa44] ss:$16 sps:$4 sm:$0xff]   ;;  %v5683_v31 = vld [vmem:[%s6801_s10 + $0x840] ss:$16 sps:$4 sm:$0xff]  }
  0xed   : > { %3966 = vmatprep.subr.bf16.mxu1 %v5612_v32  ;;  %v5686_v32 = vld [vmem:[%s6801_s10 + $0xa40] ss:$16 sps:$4 sm:$0xff]  }
  0xef   : > { %3926 = vmatpush1.bf16.msra.mxu0 %v5607_v35  ;;  %v5689_v35 = vld [vmem:[%s6801_s10 + $0x860] ss:$16 sps:$4 sm:$0xff]  }
  0xf0   : > { %3967 = vmatpush1.bf16.msra.mxu1 %v5610_v36  ;;  %3927 = vmatprep.subr.bf16.mxu0 %v5615_v39  ;;  %v5692_v36 = vld [vmem:[%s6801_s10 + $0xa60] ss:$16 sps:$4 sm:$0xff]   ;;  %v5697_v39 = vld [vmem:[%s6801_s10 + $0x884] ss:$16 sps:$4 sm:$0xff]  }
  0xf1   : > { %3968 = vmatprep.subr.bf16.mxu1 %v5618_v40  ;;  %v5700_v40 = vld [vmem:[%s6801_s10 + $0xa84] ss:$16 sps:$4 sm:$0xff]  }
  0xf3   : > { %3928 = vmatpush1.bf16.msra.mxu0 %v5613_v41  ;;  %v5695_v41 = vld [vmem:[%s6801_s10 + $0x880] ss:$16 sps:$4 sm:$0xff]  }
  0xf4   : > { %3969 = vmatpush1.bf16.msra.mxu1 %v5616_v42  ;;  %3929 = vmatprep.subr.bf16.mxu0 %v5621_v43  ;;  %v5698_v42 = vld [vmem:[%s6801_s10 + $0xa80] ss:$16 sps:$4 sm:$0xff]   ;;  %v5703_v43 = vld [vmem:[%s6801_s10 + $0x8a4] ss:$16 sps:$4 sm:$0xff]  }
  0xf5   : > { %3970 = vmatprep.subr.bf16.mxu1 %v5624_v44  ;;  %v5706_v44 = vld [vmem:[%s6801_s10 + $0xaa4] ss:$16 sps:$4 sm:$0xff]  }
  0xf7   : > { %3930 = vmatpush1.bf16.msra.mxu0 %v5619_v45  ;;  %v5701_v45 = vld [vmem:[%s6801_s10 + $0x8a0] ss:$16 sps:$4 sm:$0xff]  }
  0xf8   : > { %3971 = vmatpush1.bf16.msra.mxu1 %v5622_v46  ;;  %3931 = vmatprep.subr.bf16.mxu0 %v5627_v47  ;;  %v5704_v46 = vld [vmem:[%s6801_s10 + $0xaa0] ss:$16 sps:$4 sm:$0xff]   ;;  %v5709_v47 = vld [vmem:[%s6801_s10 + $0x8c4] ss:$16 sps:$4 sm:$0xff]  }
  0xf9   : > { %3972 = vmatprep.subr.bf16.mxu1 %v5630_v49  ;;  %v5712_v49 = vld [vmem:[%s6801_s10 + $0xac4] ss:$16 sps:$4 sm:$0xff]  }
  0xfb   : > { %3932 = vmatpush1.bf16.msra.mxu0 %v5625_v50  ;;  %v5707_v50 = vld [vmem:[%s6801_s10 + $0x8c0] ss:$16 sps:$4 sm:$0xff]  }
  0xfc   : > { %3973 = vmatpush1.bf16.msra.mxu1 %v5628_v51  ;;  %3933 = vmatprep.subr.bf16.mxu0 %v5633_v53  ;;  %v5710_v51 = vld [vmem:[%s6801_s10 + $0xac0] ss:$16 sps:$4 sm:$0xff]   ;;  %v5715_v53 = vld [vmem:[%s6801_s10 + $0x8e4] ss:$16 sps:$4 sm:$0xff]  }
  0xfd   : > { %3974 = vmatprep.subr.bf16.mxu1 %v5636_v54  ;;  %v5718_v54 = vld [vmem:[%s6801_s10 + $0xae4] ss:$16 sps:$4 sm:$0xff]  }
  0xff   : > { %3934 = vmatpush1.bf16.msra.mxu0 %v5631_v55  ;;  %v5713_v55 = vld [vmem:[%s6801_s10 + $0x8e0] ss:$16 sps:$4 sm:$0xff]  }
 0x100   : > { %3975 = vmatpush1.bf16.msra.mxu1 %v5634_v56  ;;  %3935 = vmatprep.subr.bf16.mxu0 %v5639_v57  ;;  %v5716_v56 = vld [vmem:[%s6801_s10 + $0xae0] ss:$16 sps:$4 sm:$0xff]   ;;  %v5721_v57 = vld [vmem:[%s6801_s10 + $0x904] ss:$16 sps:$4 sm:$0xff]  }
 0x101   : > { %3976 = vmatprep.subr.bf16.mxu1 %v5642_v58  ;;  %v5724_v58 = vld [vmem:[%s6801_s10 + $0xb04] ss:$16 sps:$4 sm:$0xff]  }
 0x103   : > { %3936 = vmatpush1.bf16.msra.mxu0 %v5637_v59  ;;  %v5719_v59 = vld [vmem:[%s6801_s10 + $0x900] ss:$16 sps:$4 sm:$0xff]  }
 0x104   : > { %3977 = vmatpush1.bf16.msra.mxu1 %v5640_v60  ;;  %3937 = vmatprep.subr.bf16.mxu0 %v5645_v61  ;;  %v5722_v60 = vld [vmem:[%s6801_s10 + $0xb00] ss:$16 sps:$4 sm:$0xff]   ;;  %v5727_v61 = vld [vmem:[%s6801_s10 + $0x924] ss:$16 sps:$4 sm:$0xff]  }
 0x105   : > { %3978 = vmatprep.subr.bf16.mxu1 %v5648_v62  ;;  %v5730_v62 = vld [vmem:[%s6801_s10 + $0xb24] ss:$16 sps:$4 sm:$0xff]  }
 0x107   : > { %3938 = vmatpush1.bf16.msra.mxu0 %v5643_v63  ;;  %v5725_v63 = vld [vmem:[%s6801_s10 + $0x920] ss:$16 sps:$4 sm:$0xff]  }
 0x108   : > { %3979 = vmatpush1.bf16.msra.mxu1 %v5646_v0  ;;  %3939 = vmatprep.subr.bf16.mxu0 %v5651_v1  ;;  %v5728_v0 = vld [vmem:[%s6801_s10 + $0xb20] ss:$16 sps:$4 sm:$0xff]   ;;  %v5733_v1 = vld [vmem:[%s6801_s10 + $0x944] ss:$16 sps:$4 sm:$0xff]  }
 0x109   : > { %3980 = vmatprep.subr.bf16.mxu1 %v5654_v2  ;;  %v5736_v2 = vld [vmem:[%s6801_s10 + $0xb44] ss:$16 sps:$4 sm:$0xff]  }
 0x10b   : > { %3940 = vmatpush1.bf16.msra.mxu0 %v5649_v3  ;;  %v5731_v3 = vld [vmem:[%s6801_s10 + $0x940] ss:$16 sps:$4 sm:$0xff]  }
 0x10c   : > { %3981 = vmatpush1.bf16.msra.mxu1 %v5652_v4  ;;  %3941 = vmatprep.subr.bf16.mxu0 %v5657_v5  ;;  %v5734_v4 = vld [vmem:[%s6801_s10 + $0xb40] ss:$16 sps:$4 sm:$0xff]   ;;  %v5739_v5 = vld [vmem:[%s6801_s10 + $0x964] ss:$16 sps:$4 sm:$0xff]  }
 0x10d   : > { %3982 = vmatprep.subr.bf16.mxu1 %v5660_v6  ;;  %v5742_v6 = vld [vmem:[%s6801_s10 + $0xb64] ss:$16 sps:$4 sm:$0xff]  }
 0x10f   : > { %3942 = vmatpush1.bf16.msra.mxu0 %v5655_v9  ;;  %v5737_v9 = vld [vmem:[%s6801_s10 + $0x960] ss:$16 sps:$4 sm:$0xff]  }
 0x110   : > { %3983 = vmatpush1.bf16.msra.mxu1 %v5658_v10  ;;  %3943 = vmatprep.subr.bf16.mxu0 %v5663_v11  ;;  %v5740_v10 = vld [vmem:[%s6801_s10 + $0xb60] ss:$16 sps:$4 sm:$0xff]   ;;  %v5745_v11 = vld [vmem:[%s6801_s10 + $0x984] ss:$16 sps:$4 sm:$0xff]  }
 0x111   : > { %3984 = vmatprep.subr.bf16.mxu1 %v5666_v12  ;;  %v5748_v12 = vld [vmem:[%s6801_s10 + $0xb84] ss:$16 sps:$4 sm:$0xff]  }
 0x113   : > { %3944 = vmatpush1.bf16.msra.mxu0 %v5661_v13  ;;  %v5743_v13 = vld [vmem:[%s6801_s10 + $0x980] ss:$16 sps:$4 sm:$0xff]  }
 0x114   : > { %3985 = vmatpush1.bf16.msra.mxu1 %v5664_v14  ;;  %3995 = vmatprep.subr.bf16.mxu0 %v5673_v15  ;;  %v5746_v14 = vld [vmem:[%s6801_s10 + $0xb80] ss:$16 sps:$4 sm:$0xff]   ;;  %v5751_v15 = vld [vmem:[%s6801_s10 + $0x9a4] ss:$16 sps:$4 sm:$0xff]  }
 0x115   : > { %4036 = vmatprep.subr.bf16.mxu1 %v5676_v16  ;;  %v5754_v16 = vld [vmem:[%s6801_s10 + $0xba4] ss:$16 sps:$4 sm:$0xff]  }
 0x116   : > { %3946 = vmatmul.mubr.bf16.vlgmr.msra.gmra.mrb[4].mxu0 %v6978_v17 }
 0x117   : > { %3987 = vmatmul.mubr.bf16.vlgmr.msra.gmra.mrb[4].mxu1 %v6982_v18  ;;  %3996 = vmatpush1.bf16.msra.mxu0 %v5671_v19  ;;  %v5749_v19 = vld [vmem:[%s6801_s10 + $0x9a0] ss:$16 sps:$4 sm:$0xff]  }
 0x118   : > { %4037 = vmatpush1.bf16.msra.mxu1 %v5674_v20  ;;  %3997 = vmatprep.subr.bf16.mxu0 %v5679_v21  ;;  %v5752_v20 = vld [vmem:[%s6801_s10 + $0xba0] ss:$16 sps:$4 sm:$0xff]   ;;  %v5757_v21 = vld [vmem:[%s6801_s10 + $0x9c4] ss:$16 sps:$4 sm:$0xff]  }
 0x119   : > { %4038 = vmatprep.subr.bf16.mxu1 %v5682_v22  ;;  %4027 = vmatprep.mubr.bf16.mxu0 %v6996_v25  ;;  %v5760_v22 = vld [vmem:[%s6801_s10 + $0xbc4] ss:$16 sps:$4 sm:$0xff]  }
 0x11a   : > { %4068 = vmatprep.mubr.bf16.mxu1 %v7000_v26 }
 0x11b   : > { %3998 = vmatpush1.bf16.msra.mxu0 %v5677_v27  ;;  %v5755_v27 = vld [vmem:[%s6801_s10 + $0x9c0] ss:$16 sps:$4 sm:$0xff]  }
 0x11c   : > { %4039 = vmatpush1.bf16.msra.mxu1 %v5680_v28  ;;  %3999 = vmatprep.subr.bf16.mxu0 %v5685_v29  ;;  %v5758_v28 = vld [vmem:[%s6801_s10 + $0xbc0] ss:$16 sps:$4 sm:$0xff]   ;;  %v5763_v29 = vld [vmem:[%s6801_s10 + $0x9e4] ss:$16 sps:$4 sm:$0xff]  }
 0x11d   : > { %4040 = vmatprep.subr.bf16.mxu1 %v5688_v30  ;;  %v5766_v30 = vld [vmem:[%s6801_s10 + $0xbe4] ss:$16 sps:$4 sm:$0xff]  }
 0x11f   : > { %4000 = vmatpush1.bf16.msra.mxu0 %v5683_v31  ;;  %v5761_v31 = vld [vmem:[%s6801_s10 + $0x9e0] ss:$16 sps:$4 sm:$0xff]  }
 0x120   : > { %4041 = vmatpush1.bf16.msra.mxu1 %v5686_v32  ;;  %4001 = vmatprep.subr.bf16.mxu0 %v5691_v33  ;;  %v5764_v32 = vld [vmem:[%s6801_s10 + $0xbe0] ss:$16 sps:$4 sm:$0xff]   ;;  %v5773_v33 = vld [vmem:[%s6801_s10 + $0xc04] ss:$16 sps:$4 sm:$0xff]  }
 0x121   : > { %4042 = vmatprep.subr.bf16.mxu1 %v5694_v34  ;;  %v5776_v34 = vld [vmem:[%s6801_s10 + $0xe04] ss:$16 sps:$4 sm:$0xff]  }
 0x123   : > { %4002 = vmatpush1.bf16.msra.mxu0 %v5689_v35  ;;  %v5771_v35 = vld [vmem:[%s6801_s10 + $0xc00] ss:$16 sps:$4 sm:$0xff]  }
 0x124   : > { %4043 = vmatpush1.bf16.msra.mxu1 %v5692_v36  ;;  %4003 = vmatprep.subr.bf16.mxu0 %v5697_v39  ;;  %v5774_v36 = vld [vmem:[%s6801_s10 + $0xe00] ss:$16 sps:$4 sm:$0xff]   ;;  %v7070_v39 = vcombine.low %v6989_v23, %v6989_v23 }
 0x125   : > { %4044 = vmatprep.subr.bf16.mxu1 %v5700_v40  ;;  %v7074_v40 = vcombine.low %v6992_v24, %v6992_v24 }
 0x127   : > { %4004 = vmatpush1.bf16.msra.mxu0 %v5695_v41  ;;  %v7077_v41 = vld [vmem:[%s6794_s26 + $0x30] sm:$0xff] }
 0x128   : > { %4045 = vmatpush1.bf16.msra.mxu1 %v5698_v42  ;;  %4005 = vmatprep.subr.bf16.mxu0 %v5703_v43  ;;  %v7080_v42 = vld [vmem:[%s6794_s26 + $0x38] sm:$0xff]  ;;  %v7086_v23 = vcombine.high %v7077_v41, %v7077_v41 }
 0x129   : > { %4046 = vmatprep.subr.bf16.mxu1 %v5706_v44  ;;  %v5779_v43 = vld [vmem:[%s6801_s10 + $0xc24] ss:$16 sps:$4 sm:$0xff]   ;;  %v7090_v24 = vcombine.high %v7080_v42, %v7080_v42 }
 0x12a   : > { %v5782_v44 = vld [vmem:[%s6801_s10 + $0xe24] ss:$16 sps:$4 sm:$0xff]  }
 0x12b   : > { %4006 = vmatpush1.bf16.msra.mxu0 %v5701_v45  ;;  %v5777_v45 = vld [vmem:[%s6801_s10 + $0xc20] ss:$16 sps:$4 sm:$0xff]  }
 0x12c   : > { %4047 = vmatpush1.bf16.msra.mxu1 %v5704_v46  ;;  %4007 = vmatprep.subr.bf16.mxu0 %v5709_v47  ;;  %v5780_v46 = vld [vmem:[%s6801_s10 + $0xe20] ss:$16 sps:$4 sm:$0xff]   ;;  %v5785_v47 = vld [vmem:[%s6801_s10 + $0xc44] ss:$16 sps:$4 sm:$0xff]  }
 0x12d   : > { %4048 = vmatprep.subr.bf16.mxu1 %v5712_v49  ;;  %v5788_v49 = vld [vmem:[%s6801_s10 + $0xe44] ss:$16 sps:$4 sm:$0xff]  }
 0x12f   : > { %4008 = vmatpush1.bf16.msra.mxu0 %v5707_v50  ;;  %v5783_v50 = vld [vmem:[%s6801_s10 + $0xc40] ss:$16 sps:$4 sm:$0xff]  }
 0x130   : > { %4049 = vmatpush1.bf16.msra.mxu1 %v5710_v51  ;;  %4009 = vmatprep.subr.bf16.mxu0 %v5715_v53  ;;  %v5786_v51 = vld [vmem:[%s6801_s10 + $0xe40] ss:$16 sps:$4 sm:$0xff]   ;;  %v5791_v53 = vld [vmem:[%s6801_s10 + $0xc64] ss:$16 sps:$4 sm:$0xff]  }
 0x131   : > { %4050 = vmatprep.subr.bf16.mxu1 %v5718_v54  ;;  %v5794_v54 = vld [vmem:[%s6801_s10 + $0xe64] ss:$16 sps:$4 sm:$0xff]  }
 0x133   : > { %4010 = vmatpush1.bf16.msra.mxu0 %v5713_v55  ;;  %v5789_v55 = vld [vmem:[%s6801_s10 + $0xc60] ss:$16 sps:$4 sm:$0xff]  }
 0x134   : > { %4051 = vmatpush1.bf16.msra.mxu1 %v5716_v56  ;;  %4011 = vmatprep.subr.bf16.mxu0 %v5721_v57  ;;  %v5792_v56 = vld [vmem:[%s6801_s10 + $0xe60] ss:$16 sps:$4 sm:$0xff]   ;;  %v5797_v57 = vld [vmem:[%s6801_s10 + $0xc84] ss:$16 sps:$4 sm:$0xff]  }
 0x135   : > { %4052 = vmatprep.subr.bf16.mxu1 %v5724_v58  ;;  %v5800_v58 = vld [vmem:[%s6801_s10 + $0xe84] ss:$16 sps:$4 sm:$0xff]  }
 0x137   : > { %4012 = vmatpush1.bf16.msra.mxu0 %v5719_v59  ;;  %v5795_v59 = vld [vmem:[%s6801_s10 + $0xc80] ss:$16 sps:$4 sm:$0xff]  }
 0x138   : > { %4053 = vmatpush1.bf16.msra.mxu1 %v5722_v60  ;;  %4013 = vmatprep.subr.bf16.mxu0 %v5727_v61  ;;  %v5798_v60 = vld [vmem:[%s6801_s10 + $0xe80] ss:$16 sps:$4 sm:$0xff]   ;;  %v5803_v61 = vld [vmem:[%s6801_s10 + $0xca4] ss:$16 sps:$4 sm:$0xff]  }
 0x139   : > { %4054 = vmatprep.subr.bf16.mxu1 %v5730_v62  ;;  %v5806_v62 = vld [vmem:[%s6801_s10 + $0xea4] ss:$16 sps:$4 sm:$0xff]  }
 0x13b   : > { %4014 = vmatpush1.bf16.msra.mxu0 %v5725_v63  ;;  %v5801_v63 = vld [vmem:[%s6801_s10 + $0xca0] ss:$16 sps:$4 sm:$0xff]  }
 0x13c   : > { %4055 = vmatpush1.bf16.msra.mxu1 %v5728_v0  ;;  %4015 = vmatprep.subr.bf16.mxu0 %v5733_v1  ;;  %v5804_v0 = vld [vmem:[%s6801_s10 + $0xea0] ss:$16 sps:$4 sm:$0xff]   ;;  %v5809_v1 = vld [vmem:[%s6801_s10 + $0xcc4] ss:$16 sps:$4 sm:$0xff]  }
 0x13d   : > { %4056 = vmatprep.subr.bf16.mxu1 %v5736_v2  ;;  %v5812_v2 = vld [vmem:[%s6801_s10 + $0xec4] ss:$16 sps:$4 sm:$0xff]  }
 0x13f   : > { %4016 = vmatpush1.bf16.msra.mxu0 %v5731_v3  ;;  %v5807_v3 = vld [vmem:[%s6801_s10 + $0xcc0] ss:$16 sps:$4 sm:$0xff]  }
 0x140   : > { %4057 = vmatpush1.bf16.msra.mxu1 %v5734_v4  ;;  %4017 = vmatprep.subr.bf16.mxu0 %v5739_v5  ;;  %v5810_v4 = vld [vmem:[%s6801_s10 + $0xec0] ss:$16 sps:$4 sm:$0xff]   ;;  %v5815_v5 = vld [vmem:[%s6801_s10 + $0xce4] ss:$16 sps:$4 sm:$0xff]  }
 0x141   : > { %4058 = vmatprep.subr.bf16.mxu1 %v5742_v6  ;;  %v5818_v6 = vld [vmem:[%s6801_s10 + $0xee4] ss:$16 sps:$4 sm:$0xff]  }
 0x143   : > { %4018 = vmatpush1.bf16.msra.mxu0 %v5737_v9  ;;  %v5813_v9 = vld [vmem:[%s6801_s10 + $0xce0] ss:$16 sps:$4 sm:$0xff]  }
 0x144   : > { %4059 = vmatpush1.bf16.msra.mxu1 %v5740_v10  ;;  %4019 = vmatprep.subr.bf16.mxu0 %v5745_v11  ;;  %v5816_v10 = vld [vmem:[%s6801_s10 + $0xee0] ss:$16 sps:$4 sm:$0xff]   ;;  %v5821_v11 = vld [vmem:[%s6801_s10 + $0xd04] ss:$16 sps:$4 sm:$0xff]  }
 0x145   : > { %4060 = vmatprep.subr.bf16.mxu1 %v5748_v12  ;;  %v5824_v12 = vld [vmem:[%s6801_s10 + $0xf04] ss:$16 sps:$4 sm:$0xff]  }
 0x147   : > { %4020 = vmatpush1.bf16.msra.mxu0 %v5743_v13  ;;  %v5819_v13 = vld [vmem:[%s6801_s10 + $0xd00] ss:$16 sps:$4 sm:$0xff]  }
 0x148   : > { %4061 = vmatpush1.bf16.msra.mxu1 %v5746_v14  ;;  %4021 = vmatprep.subr.bf16.mxu0 %v5751_v15  ;;  %v5822_v14 = vld [vmem:[%s6801_s10 + $0xf00] ss:$16 sps:$4 sm:$0xff]   ;;  %v5827_v15 = vld [vmem:[%s6801_s10 + $0xd24] ss:$16 sps:$4 sm:$0xff]  }
 0x149   : > { %4062 = vmatprep.subr.bf16.mxu1 %v5754_v16  ;;  %v5830_v16 = vld [vmem:[%s6801_s10 + $0xf24] ss:$16 sps:$4 sm:$0xff]  }
 0x14b   : > { %4022 = vmatpush1.bf16.msra.mxu0 %v5749_v19  ;;  %v5825_v19 = vld [vmem:[%s6801_s10 + $0xd20] ss:$16 sps:$4 sm:$0xff]  }
 0x14c   : > { %4063 = vmatpush1.bf16.msra.mxu1 %v5752_v20  ;;  %4023 = vmatprep.subr.bf16.mxu0 %v5757_v21  ;;  %v5828_v20 = vld [vmem:[%s6801_s10 + $0xf20] ss:$16 sps:$4 sm:$0xff]   ;;  %v5833_v21 = vld [vmem:[%s6801_s10 + $0xd44] ss:$16 sps:$4 sm:$0xff]  }
 0x14d   : > { %4064 = vmatprep.subr.bf16.mxu1 %v5760_v22  ;;  %v5836_v22 = vld [vmem:[%s6801_s10 + $0xf44] ss:$16 sps:$4 sm:$0xff]  }
 0x14f   : > { %4024 = vmatpush1.bf16.msra.mxu0 %v5755_v27  ;;  %v5831_v27 = vld [vmem:[%s6801_s10 + $0xd40] ss:$16 sps:$4 sm:$0xff]  }
 0x150   : > { %4065 = vmatpush1.bf16.msra.mxu1 %v5758_v28  ;;  %4025 = vmatprep.subr.bf16.mxu0 %v5763_v29  ;;  %v5834_v28 = vld [vmem:[%s6801_s10 + $0xf40] ss:$16 sps:$4 sm:$0xff]   ;;  %v5839_v29 = vld [vmem:[%s6801_s10 + $0xd64] ss:$16 sps:$4 sm:$0xff]  }
 0x151   : > { %4066 = vmatprep.subr.bf16.mxu1 %v5766_v30  ;;  %v5842_v30 = vld [vmem:[%s6801_s10 + $0xf64] ss:$16 sps:$4 sm:$0xff]  }
 0x153   : > { %4026 = vmatpush1.bf16.msra.mxu0 %v5761_v31  ;;  %v5837_v31 = vld [vmem:[%s6801_s10 + $0xd60] ss:$16 sps:$4 sm:$0xff]  }
 0x154   : > { %4067 = vmatpush1.bf16.msra.mxu1 %v5764_v32  ;;  %4077 = vmatprep.subr.bf16.mxu0 %v5773_v33  ;;  %v5840_v32 = vld [vmem:[%s6801_s10 + $0xf60] ss:$16 sps:$4 sm:$0xff]   ;;  %v5845_v33 = vld [vmem:[%s6801_s10 + $0xd84] ss:$16 sps:$4 sm:$0xff]  }
 0x155   : > { %4118 = vmatprep.subr.bf16.mxu1 %v5776_v34  ;;  %v5848_v34 = vld [vmem:[%s6801_s10 + $0xf84] ss:$16 sps:$4 sm:$0xff]  }
 0x156   : > { %4028 = vmatmul.mubr.bf16.vlgmr.msra.gmra.mrb[8].mxu0 %v7070_v39 }
 0x157   : > { %4069 = vmatmul.mubr.bf16.vlgmr.msra.gmra.mrb[8].mxu1 %v7074_v40  ;;  %4078 = vmatpush1.bf16.msra.mxu0 %v5771_v35  ;;  %v5843_v35 = vld [vmem:[%s6801_s10 + $0xd80] ss:$16 sps:$4 sm:$0xff]  }
 0x158   : > { %4119 = vmatpush1.bf16.msra.mxu1 %v5774_v36  ;;  %4079 = vmatprep.subr.bf16.mxu0 %v5779_v43  ;;  %v5846_v36 = vld [vmem:[%s6801_s10 + $0xf80] ss:$16 sps:$4 sm:$0xff]   ;;  %v5851_v43 = vld [vmem:[%s6801_s10 + $0xda4] ss:$16 sps:$4 sm:$0xff]  }
 0x159   : > { %4120 = vmatprep.subr.bf16.mxu1 %v5782_v44  ;;  %4109 = vmatprep.mubr.bf16.mxu0 %v7086_v23  ;;  %v5854_v44 = vld [vmem:[%s6801_s10 + $0xfa4] ss:$16 sps:$4 sm:$0xff]  }
 0x15a   : > { %4150 = vmatprep.mubr.bf16.mxu1 %v7090_v24 }
 0x15b   : > { %4080 = vmatpush1.bf16.msra.mxu0 %v5777_v45  ;;  %v5849_v45 = vld [vmem:[%s6801_s10 + $0xda0] ss:$16 sps:$4 sm:$0xff]  }
 0x15c   : > { %4121 = vmatpush1.bf16.msra.mxu1 %v5780_v46  ;;  %4081 = vmatprep.subr.bf16.mxu0 %v5785_v47  ;;  %v5852_v46 = vld [vmem:[%s6801_s10 + $0xfa0] ss:$16 sps:$4 sm:$0xff]   ;;  %v5857_v47 = vld [vmem:[%s6801_s10 + $0xdc4] ss:$16 sps:$4 sm:$0xff]  }
 0x15d   : > { %4122 = vmatprep.subr.bf16.mxu1 %v5788_v49  ;;  %v5860_v49 = vld [vmem:[%s6801_s10 + $0xfc4] ss:$16 sps:$4 sm:$0xff]  }
 0x15f   : > { %4082 = vmatpush1.bf16.msra.mxu0 %v5783_v50  ;;  %v5855_v50 = vld [vmem:[%s6801_s10 + $0xdc0] ss:$16 sps:$4 sm:$0xff]  }
 0x160   : > { %4123 = vmatpush1.bf16.msra.mxu1 %v5786_v51  ;;  %4083 = vmatprep.subr.bf16.mxu0 %v5791_v53  ;;  %v5858_v51 = vld [vmem:[%s6801_s10 + $0xfc0] ss:$16 sps:$4 sm:$0xff]   ;;  %v5863_v53 = vld [vmem:[%s6801_s10 + $0xde4] ss:$16 sps:$4 sm:$0xff]  }
 0x161   : > { %4124 = vmatprep.subr.bf16.mxu1 %v5794_v54  ;;  %v5866_v54 = vld [vmem:[%s6801_s10 + $0xfe4] ss:$16 sps:$4 sm:$0xff]  }
 0x163   : > { %4084 = vmatpush1.bf16.msra.mxu0 %v5789_v55  ;;  %v5861_v55 = vld [vmem:[%s6801_s10 + $0xde0] ss:$16 sps:$4 sm:$0xff]  }
 0x164   : > { %4125 = vmatpush1.bf16.msra.mxu1 %v5792_v56  ;;  %4085 = vmatprep.subr.bf16.mxu0 %v5797_v57  ;;  %v5864_v56 = vld [vmem:[%s6801_s10 + $0xfe0] ss:$16 sps:$4 sm:$0xff]   ;;  %v5873_v57 = vld [vmem:[%s6801_s10 + $0x1004] ss:$16 sps:$4 sm:$0xff]  }
 0x165   : > { %4126 = vmatprep.subr.bf16.mxu1 %v5800_v58  ;;  %v5876_v58 = vld [vmem:[%s6801_s10 + $0xc] ss:$16 sps:$4 sm:$0xff]  }
 0x167   : > { %4086 = vmatpush1.bf16.msra.mxu0 %v5795_v59  ;;  %v5871_v59 = vld [vmem:[%s6801_s10 + $0x1000] ss:$16 sps:$4 sm:$0xff]  }
 0x168   : > { %4127 = vmatpush1.bf16.msra.mxu1 %v5798_v60  ;;  %4087 = vmatprep.subr.bf16.mxu0 %v5803_v61  ;;  %v7159_v60 = vcombine.low %v7077_v41, %v7077_v41  ;;  %v7163_v61 = vcombine.low %v7080_v42, %v7080_v42  ;;  %v5877_v42 = vld [vmem:[%s6801_s10 + $0x1020] ss:$16 sps:$4 sm:$0xff]  }
 0x169   : > { %4128 = vmatprep.subr.bf16.mxu1 %v5806_v62  ;;  %v7166_v62 = vld [vmem:[%s6794_s26 + $0x40] sm:$0xff] }
 0x16a   : > { %v7173_v41 = vcombine.high %v7166_v62, %v7166_v62 }
 0x16b   : > { %4088 = vmatpush1.bf16.msra.mxu0 %v5801_v63  ;;  %v5874_v63 = vld [vmem:[%s6801_s10 + $0x8] ss:$16 sps:$4 sm:$0xff]  }
 0x16c   : > { %4129 = vmatpush1.bf16.msra.mxu1 %v5804_v0  ;;  %4089 = vmatprep.subr.bf16.mxu0 %v5809_v1  ;;  %v5879_v0 = vld [vmem:[%s6801_s10 + $0x1024] ss:$16 sps:$4 sm:$0xff]   ;;  %v5882_v1 = vld [vmem:[%s6801_s10 + $0x2c] ss:$16 sps:$4 sm:$0xff]  }
 0x16d   : > { %4130 = vmatprep.subr.bf16.mxu1 %v5812_v2  ;;  %v5880_v2 = vld [vmem:[%s6801_s10 + $0x28] ss:$16 sps:$4 sm:$0xff]  }
 0x16f   : > { %4090 = vmatpush1.bf16.msra.mxu0 %v5807_v3  ;;  %v5885_v3 = vld [vmem:[%s6801_s10 + $0x1044] ss:$16 sps:$4 sm:$0xff]  }
 0x170   : > { %4131 = vmatpush1.bf16.msra.mxu1 %v5810_v4  ;;  %4091 = vmatprep.subr.bf16.mxu0 %v5815_v5  ;;  %v5888_v4 = vld [vmem:[%s6801_s10 + $0x4c] ss:$16 sps:$4 sm:$0xff]   ;;  %v5883_v5 = vld [vmem:[%s6801_s10 + $0x1040] ss:$16 sps:$4 sm:$0xff]  }
 0x171   : > { %4132 = vmatprep.subr.bf16.mxu1 %v5818_v6  ;;  %v5886_v6 = vld [vmem:[%s6801_s10 + $0x48] ss:$16 sps:$4 sm:$0xff]  }
 0x173   : > { %4092 = vmatpush1.bf16.msra.mxu0 %v5813_v9  ;;  %v5891_v9 = vld [vmem:[%s6801_s10 + $0x1064] ss:$16 sps:$4 sm:$0xff]  }
 0x174   : > { %4133 = vmatpush1.bf16.msra.mxu1 %v5816_v10  ;;  %4093 = vmatprep.subr.bf16.mxu0 %v5821_v11  ;;  %v5894_v10 = vld [vmem:[%s6801_s10 + $0x6c] ss:$16 sps:$4 sm:$0xff]   ;;  %v5889_v11 = vld [vmem:[%s6801_s10 + $0x1060] ss:$16 sps:$4 sm:$0xff]  }
 0x175   : > { %4134 = vmatprep.subr.bf16.mxu1 %v5824_v12  ;;  %v5892_v12 = vld [vmem:[%s6801_s10 + $0x68] ss:$16 sps:$4 sm:$0xff]  }
 0x177   : > { %4094 = vmatpush1.bf16.msra.mxu0 %v5819_v13  ;;  %v5900_v13 = vld [vmem:[%s6801_s10 + $0x8c] ss:$16 sps:$4 sm:$0xff]  }
 0x178   : > { %4135 = vmatpush1.bf16.msra.mxu1 %v5822_v14  ;;  %4095 = vmatprep.subr.bf16.mxu0 %v5827_v15  ;;  %v5895_v14 = vld [vmem:[%s6801_s10 + $0x1080] ss:$16 sps:$4 sm:$0xff]   ;;  %v5898_v15 = vld [vmem:[%s6801_s10 + $0x88] ss:$16 sps:$4 sm:$0xff]  }
 0x179   : > { %4136 = vmatprep.subr.bf16.mxu1 %v5830_v16  ;;  %v5903_v16 = vld [vmem:[%s6801_s10 + $0x10a4] ss:$16 sps:$4 sm:$0xff]  }
 0x17b   : > { %4096 = vmatpush1.bf16.msra.mxu0 %v5825_v19  ;;  %v5906_v19 = vld [vmem:[%s6801_s10 + $0xac] ss:$16 sps:$4 sm:$0xff]  }
 0x17c   : > { %4137 = vmatpush1.bf16.msra.mxu1 %v5828_v20  ;;  %4097 = vmatprep.subr.bf16.mxu0 %v5833_v21  ;;  %v5901_v20 = vld [vmem:[%s6801_s10 + $0x10a0] ss:$16 sps:$4 sm:$0xff]   ;;  %v5904_v21 = vld [vmem:[%s6801_s10 + $0xa8] ss:$16 sps:$4 sm:$0xff]  }
 0x17d   : > { %4138 = vmatprep.subr.bf16.mxu1 %v5836_v22  ;;  %v5909_v22 = vld [vmem:[%s6801_s10 + $0x10c4] ss:$16 sps:$4 sm:$0xff]  }
 0x17f   : > { %4098 = vmatpush1.bf16.msra.mxu0 %v5831_v27  ;;  %v5912_v27 = vld [vmem:[%s6801_s10 + $0xcc] ss:$16 sps:$4 sm:$0xff]  }
 0x180   : > { %4139 = vmatpush1.bf16.msra.mxu1 %v5834_v28  ;;  %4099 = vmatprep.subr.bf16.mxu0 %v5839_v29 }
 0x181   : > { %4140 = vmatprep.subr.bf16.mxu1 %v5842_v30  ;;  %v5907_v30 = vld [vmem:[%s6801_s10 + $0x10c0] ss:$16 sps:$4 sm:$0xff]  }
 0x183   : > { %4100 = vmatpush1.bf16.msra.mxu0 %v5837_v31  ;;  %v5910_v31 = vld [vmem:[%s6801_s10 + $0xc8] ss:$16 sps:$4 sm:$0xff]  }
 0x184   : > { %4141 = vmatpush1.bf16.msra.mxu1 %v5840_v32  ;;  %4101 = vmatprep.subr.bf16.mxu0 %v5845_v33 }
 0x185   : > { %4142 = vmatprep.subr.bf16.mxu1 %v5848_v34 }
 0x187   : > { %4102 = vmatpush1.bf16.msra.mxu0 %v5843_v35 }
 0x188   : > { %4143 = vmatpush1.bf16.msra.mxu1 %v5846_v36  ;;  %4103 = vmatprep.subr.bf16.mxu0 %v5851_v43 }
 0x189   : > { %4144 = vmatprep.subr.bf16.mxu1 %v5854_v44 }
 0x18b   : > { %4104 = vmatpush1.bf16.msra.mxu0 %v5849_v45 }
 0x18c   : > { %4145 = vmatpush1.bf16.msra.mxu1 %v5852_v46  ;;  %4105 = vmatprep.subr.bf16.mxu0 %v5857_v47  ;;  %v5915_v46 = vld [vmem:[%s6801_s10 + $0x10e4] ss:$16 sps:$4 sm:$0xff]   ;;  %v5918_v47 = vld [vmem:[%s6801_s10 + $0xec] ss:$16 sps:$4 sm:$0xff]  }
 0x18d   : > { %4146 = vmatprep.subr.bf16.mxu1 %v5860_v49  ;;  %v5913_v49 = vld [vmem:[%s6801_s10 + $0x10e0] ss:$16 sps:$4 sm:$0xff]  }
 0x18f   : > { %4106 = vmatpush1.bf16.msra.mxu0 %v5855_v50  ;;  %v5916_v50 = vld [vmem:[%s6801_s10 + $0xe8] ss:$16 sps:$4 sm:$0xff]  }
 0x190   : > { %4147 = vmatpush1.bf16.msra.mxu1 %v5858_v51  ;;  %4107 = vmatprep.subr.bf16.mxu0 %v5863_v53  ;;  %v5921_v51 = vld [vmem:[%s6801_s10 + $0x1104] ss:$16 sps:$4 sm:$0xff]   ;;  %v5924_v53 = vld [vmem:[%s6801_s10 + $0x10c] ss:$16 sps:$4 sm:$0xff]  }
 0x191   : > { %4148 = vmatprep.subr.bf16.mxu1 %v5866_v54  ;;  %v5919_v54 = vld [vmem:[%s6801_s10 + $0x1100] ss:$16 sps:$4 sm:$0xff]  }
 0x193   : > { %4108 = vmatpush1.bf16.msra.mxu0 %v5861_v55  ;;  %v5922_v55 = vld [vmem:[%s6801_s10 + $0x108] ss:$16 sps:$4 sm:$0xff]  }
 0x194   : > { %4149 = vmatpush1.bf16.msra.mxu1 %v5864_v56  ;;  %4159 = vmatprep.subr.bf16.mxu0 %v5873_v57  ;;  %v5927_v56 = vld [vmem:[%s6801_s10 + $0x1124] ss:$16 sps:$4 sm:$0xff]   ;;  %v5930_v57 = vld [vmem:[%s6801_s10 + $0x12c] ss:$16 sps:$4 sm:$0xff]  }
 0x195   : > { %4200 = vmatprep.subr.bf16.mxu1 %v5876_v58  ;;  %v5925_v58 = vld [vmem:[%s6801_s10 + $0x1120] ss:$16 sps:$4 sm:$0xff]  }
 0x196   : > { %4110 = vmatmul.mubr.bf16.vlgmr.msra.gmra.mrb[12].mxu0 %v7159_v60 }
 0x197   : > { %4151 = vmatmul.mubr.bf16.vlgmr.msra.gmra.mrb[12].mxu1 %v7163_v61  ;;  %4160 = vmatpush1.bf16.msra.mxu0 %v5871_v59  ;;  %v5928_v59 = vld [vmem:[%s6801_s10 + $0x128] ss:$16 sps:$4 sm:$0xff]  }
 0x198   : > { %4201 = vmatpush1.bf16.msra.mxu1 %v5874_v63  ;;  %4161 = vmatprep.subr.bf16.mxu0 %v5879_v0  ;;  %v5933_v63 = vld [vmem:[%s6801_s10 + $0x1144] ss:$16 sps:$4 sm:$0xff]   ;;  %v5936_v0 = vld [vmem:[%s6801_s10 + $0x14c] ss:$16 sps:$4 sm:$0xff]  }
 0x199   : > { %4202 = vmatprep.subr.bf16.mxu1 %v5882_v1  ;;  %4191 = vmatprep.mubr.bf16.mxu0 %v7173_v41  ;;  %v5931_v1 = vld [vmem:[%s6801_s10 + $0x1140] ss:$16 sps:$4 sm:$0xff]  }
 0x19a   : > { %4232 = vmatprep.mubr.bf16.mxu1 %v6863_v48  ;;  %v5897_v48 = vld [vmem:[%s6801_s10 + $0x1084] ss:$16 sps:$4 sm:$0xff]  }
 0x19b   : > { %4162 = vmatpush1.bf16.msra.mxu0 %v5877_v42  ;;  %v5934_v42 = vld [vmem:[%s6801_s10 + $0x148] ss:$16 sps:$4 sm:$0xff]  }
 0x19c   : > { %4203 = vmatpush1.bf16.msra.mxu1 %v5880_v2  ;;  %4163 = vmatprep.subr.bf16.mxu0 %v5885_v3  ;;  %v5939_v2 = vld [vmem:[%s6801_s10 + $0x1164] ss:$16 sps:$4 sm:$0xff]   ;;  %v5942_v3 = vld [vmem:[%s6801_s10 + $0x16c] ss:$16 sps:$4 sm:$0xff]  }
 0x19d   : > { %4204 = vmatprep.subr.bf16.mxu1 %v5888_v4  ;;  %v5937_v4 = vld [vmem:[%s6801_s10 + $0x1160] ss:$16 sps:$4 sm:$0xff]  }
 0x19f   : > { %4164 = vmatpush1.bf16.msra.mxu0 %v5883_v5  ;;  %v5940_v5 = vld [vmem:[%s6801_s10 + $0x168] ss:$16 sps:$4 sm:$0xff]  }
 0x1a0   : > { %4205 = vmatpush1.bf16.msra.mxu1 %v5886_v6  ;;  %4165 = vmatprep.subr.bf16.mxu0 %v5891_v9  ;;  %v5945_v6 = vld [vmem:[%s6801_s10 + $0x1184] ss:$16 sps:$4 sm:$0xff]   ;;  %v5948_v9 = vld [vmem:[%s6801_s10 + $0x18c] ss:$16 sps:$4 sm:$0xff]  }
 0x1a1   : > { %4206 = vmatprep.subr.bf16.mxu1 %v5894_v10  ;;  %v5943_v10 = vld [vmem:[%s6801_s10 + $0x1180] ss:$16 sps:$4 sm:$0xff]  }
 0x1a3   : > { %4166 = vmatpush1.bf16.msra.mxu0 %v5889_v11  ;;  %v5946_v11 = vld [vmem:[%s6801_s10 + $0x188] ss:$16 sps:$4 sm:$0xff]  }
 0x1a4   : > { %4207 = vmatpush1.bf16.msra.mxu1 %v5892_v12  ;;  %4167 = vmatprep.subr.bf16.mxu0 %v5897_v48  ;;  %v5951_v12 = vld [vmem:[%s6801_s10 + $0x11a4] ss:$16 sps:$4 sm:$0xff]   ;;  %v5954_v48 = vld [vmem:[%s6801_s10 + $0x1ac] ss:$16 sps:$4 sm:$0xff]  }
 0x1a5   : > { %4208 = vmatprep.subr.bf16.mxu1 %v5900_v13  ;;  %v5949_v13 = vld [vmem:[%s6801_s10 + $0x11a0] ss:$16 sps:$4 sm:$0xff]  }
 0x1a7   : > { %4168 = vmatpush1.bf16.msra.mxu0 %v5895_v14  ;;  %v5952_v14 = vld [vmem:[%s6801_s10 + $0x1a8] ss:$16 sps:$4 sm:$0xff]  }
 0x1a8   : > { %4209 = vmatpush1.bf16.msra.mxu1 %v5898_v15  ;;  %4169 = vmatprep.subr.bf16.mxu0 %v5903_v16  ;;  %v5957_v15 = vld [vmem:[%s6801_s10 + $0x11c4] ss:$16 sps:$4 sm:$0xff]   ;;  %v5960_v16 = vld [vmem:[%s6801_s10 + $0x1cc] ss:$16 sps:$4 sm:$0xff]  }
 0x1a9   : > { %4210 = vmatprep.subr.bf16.mxu1 %v5906_v19  ;;  %v3865_v28 = vpop.f32.mrb[0].mxu0  ;;  %v5955_v19 = vld [vmem:[%s6801_s10 + $0x11c0] ss:$16 sps:$4 sm:$0xff]  }
 0x1aa   : > { %v3906_v29 = vpop.f32.mrb[0].mxu1  ;;  %v3867_v33 = vpop.f32.mrb[1].mxu0 }
 0x1ab   : > { %v7201_v32 = vadd.f32 %v3906_v29, %v3865_v28  ;;  %v3908_v34 = vpop.f32.mrb[1].mxu1  ;;  %v3869_v36 = vpop.f32.mrb[2].mxu0  ;;  %4170 = vmatpush1.bf16.msra.mxu0 %v5901_v20  ;;  %v5958_v20 = vld [vmem:[%s6801_s10 + $0x1c8] ss:$16 sps:$4 sm:$0xff]   ;;  %v5971_v29 = vld [vmem:[%s6801_s10 + $0x20c] ss:$16 sps:$4 sm:$0xff]  }
 0x1ac   : > { %v7203_v35 = vadd.f32 %v3908_v34, %v3867_v33  ;;  %v3910_v43 = vpop.f32.mrb[2].mxu1  ;;  %4211 = vmatpush1.bf16.msra.mxu1 %v5904_v21  ;;  %v3870_v44 = vpop.f32.mrb[3].mxu0  ;;  %4171 = vmatprep.subr.bf16.mxu0 %v5909_v22  ;;  %v5963_v21 = vld [vmem:[%s6801_s10 + $0x11e4] ss:$16 sps:$4 sm:$0xff]   ;;  %v5966_v22 = vld [vmem:[%s6801_s10 + $0x1ec] ss:$16 sps:$4 sm:$0xff]   ;;  %v7247_v34 = vcombine.low %v7166_v62, %v7166_v62 }
 0x1ad   : > { %v3911_v45 = vpop.f32.mrb[3].mxu1  ;;  %4212 = vmatprep.subr.bf16.mxu1 %v5912_v27  ;;  %v5961_v27 = vld [vmem:[%s6801_s10 + $0x11e0] ss:$16 sps:$4 sm:$0xff]   ;;  %v5964_v28 = vld [vmem:[%s6801_s10 + $0x1e8] ss:$16 sps:$4 sm:$0xff]  }
 0x1ae   : > { %v5972_v33 = vld [vmem:[%s6801_s10 + $0x408] ss:$16 sps:$4 sm:$0xff]   ;;  %v5977_v36 = vld [vmem:[%s6801_s10 + $0x22c] ss:$16 sps:$4 sm:$0xff]  }
 0x1af   : > { %4172 = vmatpush1.bf16.msra.mxu0 %v5907_v30  ;;  %v5974_v30 = vld [vmem:[%s6801_s10 + $0x40c] ss:$16 sps:$4 sm:$0xff]   ;;  %v5975_v44 = vld [vmem:[%s6801_s10 + $0x228] ss:$16 sps:$4 sm:$0xff]  }
 0x1b0   : > { %4213 = vmatpush1.bf16.msra.mxu1 %v5910_v31  ;;  %4173 = vmatprep.subr.bf16.mxu0 %v5915_v46  ;;  %v5969_v31 = vld [vmem:[%s6801_s10 + $0x208] ss:$16 sps:$4 sm:$0xff]   ;;  %v5980_v43 = vld [vmem:[%s6801_s10 + $0x42c] ss:$16 sps:$4 sm:$0xff]  }
 0x1b1   : > { %4214 = vmatprep.subr.bf16.mxu1 %v5918_v47  ;;  %v5978_v62 = vld [vmem:[%s6801_s10 + $0x428] ss:$16 sps:$4 sm:$0xff]   ;;  %v5983_v45 = vld [vmem:[%s6801_s10 + $0x24c] ss:$16 sps:$4 sm:$0xff]  }
 0x1b2   : > { %v5986_v46 = vld [vmem:[%s6801_s10 + $0x44c] ss:$16 sps:$4 sm:$0xff]   ;;  %v5984_v47 = vld [vmem:[%s6801_s10 + $0x448] ss:$16 sps:$4 sm:$0xff]  }
 0x1b3   : > { %4174 = vmatpush1.bf16.msra.mxu0 %v5913_v49  ;;  %v5989_v49 = vld [vmem:[%s6801_s10 + $0x26c] ss:$16 sps:$4 sm:$0xff]  }
 0x1b4   : > { %4215 = vmatpush1.bf16.msra.mxu1 %v5916_v50  ;;  %4175 = vmatprep.subr.bf16.mxu0 %v5921_v51  ;;  %v5992_v50 = vld [vmem:[%s6801_s10 + $0x46c] ss:$16 sps:$4 sm:$0xff]   ;;  %v5990_v51 = vld [vmem:[%s6801_s10 + $0x468] ss:$16 sps:$4 sm:$0xff]  }
 0x1b5   : > { %4216 = vmatprep.subr.bf16.mxu1 %v5924_v53  ;;  %v5998_v53 = vld [vmem:[%s6801_s10 + $0x48c] ss:$16 sps:$4 sm:$0xff]  }
 0x1b7   : > { %4176 = vmatpush1.bf16.msra.mxu0 %v5919_v54  ;;  %v5993_v54 = vld [vmem:[%s6801_s10 + $0x288] ss:$16 sps:$4 sm:$0xff]  }
 0x1b8   : > { %4217 = vmatpush1.bf16.msra.mxu1 %v5922_v55  ;;  %4177 = vmatprep.subr.bf16.mxu0 %v5927_v56  ;;  %v5996_v55 = vld [vmem:[%s6801_s10 + $0x488] ss:$16 sps:$4 sm:$0xff]   ;;  %v6001_v56 = vld [vmem:[%s6801_s10 + $0x2ac] ss:$16 sps:$4 sm:$0xff]  }
 0x1b9   : > { %4218 = vmatprep.subr.bf16.mxu1 %v5930_v57  ;;  %v6004_v57 = vld [vmem:[%s6801_s10 + $0x4ac] ss:$16 sps:$4 sm:$0xff]  }
 0x1bb   : > { %4178 = vmatpush1.bf16.msra.mxu0 %v5925_v58  ;;  %v5999_v58 = vld [vmem:[%s6801_s10 + $0x2a8] ss:$16 sps:$4 sm:$0xff]  }
 0x1bc   : > { %4219 = vmatpush1.bf16.msra.mxu1 %v5928_v59  ;;  %4179 = vmatprep.subr.bf16.mxu0 %v5933_v63  ;;  %v6002_v59 = vld [vmem:[%s6801_s10 + $0x4a8] ss:$16 sps:$4 sm:$0xff]   ;;  %v6007_v63 = vld [vmem:[%s6801_s10 + $0x2cc] ss:$16 sps:$4 sm:$0xff]  }
 0x1bd   : > { %4220 = vmatprep.subr.bf16.mxu1 %v5936_v0  ;;  %v6010_v0 = vld [vmem:[%s6801_s10 + $0x4cc] ss:$16 sps:$4 sm:$0xff]  }
 0x1bf   : > { %4180 = vmatpush1.bf16.msra.mxu0 %v5931_v1 }
 0x1c0   : > { %4221 = vmatpush1.bf16.msra.mxu1 %v5934_v42  ;;  %4181 = vmatprep.subr.bf16.mxu0 %v5939_v2  ;;  %v6005_v2 = vld [vmem:[%s6801_s10 + $0x2c8] ss:$16 sps:$4 sm:$0xff]  }
 0x1c1   : > { %4222 = vmatprep.subr.bf16.mxu1 %v5942_v3  ;;  %v6008_v3 = vld [vmem:[%s6801_s10 + $0x4c8] ss:$16 sps:$4 sm:$0xff]  }
 0x1c3   : > { %4182 = vmatpush1.bf16.msra.mxu0 %v5937_v4 }
 0x1c4   : > { %4223 = vmatpush1.bf16.msra.mxu1 %v5940_v5  ;;  %4183 = vmatprep.subr.bf16.mxu0 %v5945_v6 }
 0x1c5   : > { %4224 = vmatprep.subr.bf16.mxu1 %v5948_v9 }
 0x1c7   : > { %4184 = vmatpush1.bf16.msra.mxu0 %v5943_v10 }
 0x1c8   : > { %4225 = vmatpush1.bf16.msra.mxu1 %v5946_v11  ;;  %4185 = vmatprep.subr.bf16.mxu0 %v5951_v12 }
 0x1c9   : > { %4226 = vmatprep.subr.bf16.mxu1 %v5954_v48 }
 0x1cb   : > { %4186 = vmatpush1.bf16.msra.mxu0 %v5949_v13 }
 0x1cc   : > { %4227 = vmatpush1.bf16.msra.mxu1 %v5952_v14  ;;  %4187 = vmatprep.subr.bf16.mxu0 %v5957_v15  ;;  %v6016_v14 = vld [vmem:[%s6801_s10 + $0x4ec] ss:$16 sps:$4 sm:$0xff]  }
 0x1cd   : > { %4228 = vmatprep.subr.bf16.mxu1 %v5960_v16  ;;  %v6014_v16 = vld [vmem:[%s6801_s10 + $0x4e8] ss:$16 sps:$4 sm:$0xff]  }
 0x1cf   : > { %4188 = vmatpush1.bf16.msra.mxu0 %v5955_v19  ;;  %v6019_v19 = vld [vmem:[%s6801_s10 + $0x30c] ss:$16 sps:$4 sm:$0xff]  }
 0x1d0   : > { %4229 = vmatpush1.bf16.msra.mxu1 %v5958_v20  ;;  %4189 = vmatprep.subr.bf16.mxu0 %v5963_v21  ;;  %v6022_v20 = vld [vmem:[%s6801_s10 + $0x50c] ss:$16 sps:$4 sm:$0xff]   ;;  %v6017_v21 = vld [vmem:[%s6801_s10 + $0x308] ss:$16 sps:$4 sm:$0xff]  }
 0x1d1   : > { %4230 = vmatprep.subr.bf16.mxu1 %v5966_v22  ;;  %v6020_v22 = vld [vmem:[%s6801_s10 + $0x508] ss:$16 sps:$4 sm:$0xff]  }
 0x1d3   : > { %4190 = vmatpush1.bf16.msra.mxu0 %v5961_v27  ;;  %v6025_v27 = vld [vmem:[%s6801_s10 + $0x32c] ss:$16 sps:$4 sm:$0xff]  }
 0x1d4   : > { %4231 = vmatpush1.bf16.msra.mxu1 %v5964_v28  ;;  %4241 = vmatprep.subr.bf16.mxu0 %v5971_v29  ;;  %v6028_v28 = vld [vmem:[%s6801_s10 + $0x52c] ss:$16 sps:$4 sm:$0xff]   ;;  %v6023_v29 = vld [vmem:[%s6801_s10 + $0x328] ss:$16 sps:$4 sm:$0xff]  }
 0x1d5   : > { %4282 = vmatprep.subr.bf16.mxu1 %v5974_v30  ;;  %v6026_v30 = vld [vmem:[%s6801_s10 + $0x528] ss:$16 sps:$4 sm:$0xff]  }
 0x1d6   : > { %4192 = vmatmul.mubr.bf16.vlgmr.msra.gmra.mrb[16].mxu0 %v7247_v34 }
 0x1d7   : > { %4233 = vmatmul.mubr.bf16.vlgmr.msra.gmra.mrb[16].mxu1 %v6890_v7  ;;  %4242 = vmatpush1.bf16.msra.mxu0 %v5969_v31  ;;  %v5981_v7 = vld [vmem:[%s6801_s10 + $0x248] ss:$16 sps:$4 sm:$0xff]   ;;  %v6031_v31 = vld [vmem:[%s6801_s10 + $0x34c] ss:$16 sps:$4 sm:$0xff]  }
 0x1d8   : > { %4283 = vmatpush1.bf16.msra.mxu1 %v5972_v33  ;;  %4243 = vmatprep.subr.bf16.mxu0 %v5977_v36  ;;  %v6034_v33 = vld [vmem:[%s6801_s10 + $0x54c] ss:$16 sps:$4 sm:$0xff]   ;;  %v6029_v36 = vld [vmem:[%s6801_s10 + $0x348] ss:$16 sps:$4 sm:$0xff]  }
 0x1d9   : > { %4284 = vmatprep.subr.bf16.mxu1 %v5980_v43  ;;  %4273 = vmatprep.mubr.bf16.mxu0 %v6868_v52  ;;  %v5987_v52 = vld [vmem:[%s6801_s10 + $0x268] ss:$16 sps:$4 sm:$0xff]  }
 0x1da   : > { %4314 = vmatprep.mubr.bf16.mxu1 %v6930_v37  ;;  %v5995_v37 = vld [vmem:[%s6801_s10 + $0x28c] ss:$16 sps:$4 sm:$0xff]   ;;  %v6032_v43 = vld [vmem:[%s6801_s10 + $0x548] ss:$16 sps:$4 sm:$0xff]  }
 0x1db   : > { %4244 = vmatpush1.bf16.msra.mxu0 %v5975_v44  ;;  %v6037_v44 = vld [vmem:[%s6801_s10 + $0x36c] ss:$16 sps:$4 sm:$0xff]  }
 0x1dc   : > { %4285 = vmatpush1.bf16.msra.mxu1 %v5978_v62  ;;  %4245 = vmatprep.subr.bf16.mxu0 %v5983_v45  ;;  %v6040_v62 = vld [vmem:[%s6801_s10 + $0x56c] ss:$16 sps:$4 sm:$0xff]   ;;  %v6035_v45 = vld [vmem:[%s6801_s10 + $0x368] ss:$16 sps:$4 sm:$0xff]  }
 0x1dd   : > { %4286 = vmatprep.subr.bf16.mxu1 %v5986_v46  ;;  %v6038_v46 = vld [vmem:[%s6801_s10 + $0x568] ss:$16 sps:$4 sm:$0xff]  }
 0x1df   : > { %4246 = vmatpush1.bf16.msra.mxu0 %v5981_v7  ;;  %v6043_v7 = vld [vmem:[%s6801_s10 + $0x38c] ss:$16 sps:$4 sm:$0xff]  }
 0x1e0   : > { %4287 = vmatpush1.bf16.msra.mxu1 %v5984_v47  ;;  %4247 = vmatprep.subr.bf16.mxu0 %v5989_v49  ;;  %v6046_v47 = vld [vmem:[%s6801_s10 + $0x58c] ss:$16 sps:$4 sm:$0xff]   ;;  %v6041_v49 = vld [vmem:[%s6801_s10 + $0x388] ss:$16 sps:$4 sm:$0xff]  }
 0x1e1   : > { %4288 = vmatprep.subr.bf16.mxu1 %v5992_v50  ;;  %v6044_v50 = vld [vmem:[%s6801_s10 + $0x588] ss:$16 sps:$4 sm:$0xff]  }
 0x1e3   : > { %4248 = vmatpush1.bf16.msra.mxu0 %v5987_v52  ;;  %v6049_v52 = vld [vmem:[%s6801_s10 + $0x3ac] ss:$16 sps:$4 sm:$0xff]  }
 0x1e4   : > { %4289 = vmatpush1.bf16.msra.mxu1 %v5990_v51  ;;  %4249 = vmatprep.subr.bf16.mxu0 %v5995_v37  ;;  %v6052_v51 = vld [vmem:[%s6801_s10 + $0x5ac] ss:$16 sps:$4 sm:$0xff]   ;;  %v6047_v37 = vld [vmem:[%s6801_s10 + $0x3a8] ss:$16 sps:$4 sm:$0xff]  }
 0x1e5   : > { %4290 = vmatprep.subr.bf16.mxu1 %v5998_v53  ;;  %v6050_v53 = vld [vmem:[%s6801_s10 + $0x5a8] ss:$16 sps:$4 sm:$0xff]  }
 0x1e7   : > { %4250 = vmatpush1.bf16.msra.mxu0 %v5993_v54  ;;  %v6055_v54 = vld [vmem:[%s6801_s10 + $0x3cc] ss:$16 sps:$4 sm:$0xff]  }
 0x1e8   : > { %4291 = vmatpush1.bf16.msra.mxu1 %v5996_v55  ;;  %4251 = vmatprep.subr.bf16.mxu0 %v6001_v56  ;;  %v6058_v55 = vld [vmem:[%s6801_s10 + $0x5cc] ss:$16 sps:$4 sm:$0xff]   ;;  %v6053_v56 = vld [vmem:[%s6801_s10 + $0x3c8] ss:$16 sps:$4 sm:$0xff]  }
 0x1e9   : > { %4292 = vmatprep.subr.bf16.mxu1 %v6004_v57  ;;  %v3947_v1 = vpop.f32.mrb[4].mxu0  ;;  %v6056_v57 = vld [vmem:[%s6801_s10 + $0x5c8] ss:$16 sps:$4 sm:$0xff]  }
 0x1ea   : > { %v3988_v42 = vpop.f32.mrb[4].mxu1  ;;  %v3948_v4 = vadd.f32 %v3947_v1, %v7201_v32  ;;  %v3949_v5 = vpop.f32.mrb[5].mxu0  ;;  %v6013_v32 = vld [vmem:[%s6801_s10 + $0x2ec] ss:$16 sps:$4 sm:$0xff]  }
 0x1eb   : > { %v3990_v6 = vpop.f32.mrb[5].mxu1  ;;  %v3950_v9 = vadd.f32 %v3949_v5, %v7203_v35  ;;  %v3951_v10 = vpop.f32.mrb[6].mxu0  ;;  %4252 = vmatpush1.bf16.msra.mxu0 %v5999_v58  ;;  %v6011_v35 = vld [vmem:[%s6801_s10 + $0x2e8] ss:$16 sps:$4 sm:$0xff]   ;;  %v6061_v58 = vld [vmem:[%s6801_s10 + $0x3ec] ss:$16 sps:$4 sm:$0xff]  }
 0x1ec   : > { %v3992_v11 = vpop.f32.mrb[6].mxu1  ;;  %4293 = vmatpush1.bf16.msra.mxu1 %v6002_v59  ;;  %v7279_v12 = vadd.f32 %v3988_v42, %v3948_v4  ;;  %v3952_v48 = vpop.f32.mrb[7].mxu0  ;;  %4253 = vmatprep.subr.bf16.mxu0 %v6007_v63  ;;  %v6064_v59 = vld [vmem:[%s6801_s10 + $0x5ec] ss:$16 sps:$4 sm:$0xff]   ;;  %v6059_v63 = vld [vmem:[%s6801_s10 + $0x3e8] ss:$16 sps:$4 sm:$0xff]  }
 0x1ed   : > { %v3993_v13 = vpop.f32.mrb[7].mxu1  ;;  %4294 = vmatprep.subr.bf16.mxu1 %v6010_v0  ;;  %v7283_v15 = vadd.f32 %v3990_v6, %v3950_v9  ;;  %v6062_v0 = vld [vmem:[%s6801_s10 + $0x5e8] ss:$16 sps:$4 sm:$0xff]   ;;  %v6067_v1 = vld [vmem:[%s6801_s10 + $0x60c] ss:$16 sps:$4 sm:$0xff]  }
 0x1ee   : > { %v6070_v42 = vld [vmem:[%s6801_s10 + $0x80c] ss:$16 sps:$4 sm:$0xff]   ;;  %v6071_v6 = vld [vmem:[%s6801_s10 + $0x628] ss:$16 sps:$4 sm:$0xff]  }
 0x1ef   : > { %4254 = vmatpush1.bf16.msra.mxu0 %v6005_v2  ;;  %v6065_v2 = vld [vmem:[%s6801_s10 + $0x608] ss:$16 sps:$4 sm:$0xff]   ;;  %v6073_v4 = vld [vmem:[%s6801_s10 + $0x62c] ss:$16 sps:$4 sm:$0xff]  }
 0x1f0   : > { %4295 = vmatpush1.bf16.msra.mxu1 %v6008_v3  ;;  %4255 = vmatprep.subr.bf16.mxu0 %v6013_v32  ;;  %v6068_v3 = vld [vmem:[%s6801_s10 + $0x808] ss:$16 sps:$4 sm:$0xff]   ;;  %v6076_v5 = vld [vmem:[%s6801_s10 + $0x82c] ss:$16 sps:$4 sm:$0xff]  }
 0x1f1   : > { %4296 = vmatprep.subr.bf16.mxu1 %v6016_v14  ;;  %v6074_v9 = vld [vmem:[%s6801_s10 + $0x828] ss:$16 sps:$4 sm:$0xff]   ;;  %v6079_v10 = vld [vmem:[%s6801_s10 + $0x64c] ss:$16 sps:$4 sm:$0xff]  }
 0x1f2   : > { %v6082_v11 = vld [vmem:[%s6801_s10 + $0x84c] ss:$16 sps:$4 sm:$0xff]   ;;  %v6083_v32 = vld [vmem:[%s6801_s10 + $0x668] ss:$16 sps:$4 sm:$0xff]  }
 0x1f3   : > { %4256 = vmatpush1.bf16.msra.mxu0 %v6011_v35  ;;  %v6085_v48 = vld [vmem:[%s6801_s10 + $0x66c] ss:$16 sps:$4 sm:$0xff]   ;;  %v6089_v35 = vld [vmem:[%s6801_s10 + $0x688] ss:$16 sps:$4 sm:$0xff]  }
 0x1f4   : > { %4297 = vmatpush1.bf16.msra.mxu1 %v6014_v16  ;;  %4257 = vmatprep.subr.bf16.mxu0 %v6019_v19  ;;  %v6088_v13 = vld [vmem:[%s6801_s10 + $0x86c] ss:$16 sps:$4 sm:$0xff]   ;;  %v6092_v16 = vld [vmem:[%s6801_s10 + $0x888] ss:$16 sps:$4 sm:$0xff]  }
 0x1f5   : > { %4298 = vmatprep.subr.bf16.mxu1 %v6022_v20  ;;  %v6094_v14 = vld [vmem:[%s6801_s10 + $0x88c] ss:$16 sps:$4 sm:$0xff]  }
 0x1f6   : > { %v6097_v19 = vld [vmem:[%s6801_s10 + $0x6ac] ss:$16 sps:$4 sm:$0xff]  }
 0x1f7   : > { %4258 = vmatpush1.bf16.msra.mxu0 %v6017_v21  ;;  %v6100_v20 = vld [vmem:[%s6801_s10 + $0x8ac] ss:$16 sps:$4 sm:$0xff]   ;;  %v6095_v21 = vld [vmem:[%s6801_s10 + $0x6a8] ss:$16 sps:$4 sm:$0xff]  }
 0x1f8   : > { %4299 = vmatpush1.bf16.msra.mxu1 %v6020_v22  ;;  %4259 = vmatprep.subr.bf16.mxu0 %v6025_v27  ;;  %v6098_v22 = vld [vmem:[%s6801_s10 + $0x8a8] ss:$16 sps:$4 sm:$0xff]   ;;  %v6103_v27 = vld [vmem:[%s6801_s10 + $0x6cc] ss:$16 sps:$4 sm:$0xff]  }
 0x1f9   : > { %4300 = vmatprep.subr.bf16.mxu1 %v6028_v28  ;;  %v6106_v28 = vld [vmem:[%s6801_s10 + $0x8cc] ss:$16 sps:$4 sm:$0xff]  }
 0x1fb   : > { %4260 = vmatpush1.bf16.msra.mxu0 %v6023_v29 }
 0x1fc   : > { %4301 = vmatpush1.bf16.msra.mxu1 %v6026_v30  ;;  %4261 = vmatprep.subr.bf16.mxu0 %v6031_v31 }
 0x1fd   : > { %4302 = vmatprep.subr.bf16.mxu1 %v6034_v33 }
 0x1ff   : > { %4262 = vmatpush1.bf16.msra.mxu0 %v6029_v36 }
 0x200   : > { %4303 = vmatpush1.bf16.msra.mxu1 %v6032_v43  ;;  %4263 = vmatprep.subr.bf16.mxu0 %v6037_v44 }
 0x201   : > { %4304 = vmatprep.subr.bf16.mxu1 %v6040_v62 }
 0x203   : > { %4264 = vmatpush1.bf16.msra.mxu0 %v6035_v45  ;;  %v6101_v45 = vld [vmem:[%s6801_s10 + $0x6c8] ss:$16 sps:$4 sm:$0xff]  }
 0x204   : > { %4305 = vmatpush1.bf16.msra.mxu1 %v6038_v46  ;;  %4265 = vmatprep.subr.bf16.mxu0 %v6043_v7  ;;  %v6104_v46 = vld [vmem:[%s6801_s10 + $0x8c8] ss:$16 sps:$4 sm:$0xff]  }
 0x205   : > { %4306 = vmatprep.subr.bf16.mxu1 %v6046_v47 }
 0x207   : > { %4266 = vmatpush1.bf16.msra.mxu0 %v6041_v49 }
 0x208   : > { %4307 = vmatpush1.bf16.msra.mxu1 %v6044_v50  ;;  %4267 = vmatprep.subr.bf16.mxu0 %v6049_v52  ;;  %v6107_v52 = vld [vmem:[%s6801_s10 + $0x6e8] ss:$16 sps:$4 sm:$0xff]  }
 0x209   : > { %4308 = vmatprep.subr.bf16.mxu1 %v6052_v51  ;;  %v6110_v51 = vld [vmem:[%s6801_s10 + $0x8e8] ss:$16 sps:$4 sm:$0xff]  }
 0x20b   : > { %4268 = vmatpush1.bf16.msra.mxu0 %v6047_v37  ;;  %v6115_v37 = vld [vmem:[%s6801_s10 + $0x70c] ss:$16 sps:$4 sm:$0xff]  }
 0x20c   : > { %4309 = vmatpush1.bf16.msra.mxu1 %v6050_v53  ;;  %4269 = vmatprep.subr.bf16.mxu0 %v6055_v54  ;;  %v6118_v53 = vld [vmem:[%s6801_s10 + $0x90c] ss:$16 sps:$4 sm:$0xff]   ;;  %v6113_v54 = vld [vmem:[%s6801_s10 + $0x708] ss:$16 sps:$4 sm:$0xff]  }
 0x20d   : > { %4310 = vmatprep.subr.bf16.mxu1 %v6058_v55  ;;  %v6116_v55 = vld [vmem:[%s6801_s10 + $0x908] ss:$16 sps:$4 sm:$0xff]  }
 0x20f   : > { %4270 = vmatpush1.bf16.msra.mxu0 %v6053_v56  ;;  %v6121_v56 = vld [vmem:[%s6801_s10 + $0x72c] ss:$16 sps:$4 sm:$0xff]  }
 0x210   : > { %4311 = vmatpush1.bf16.msra.mxu1 %v6056_v57  ;;  %4271 = vmatprep.subr.bf16.mxu0 %v6061_v58  ;;  %v6124_v57 = vld [vmem:[%s6801_s10 + $0x92c] ss:$16 sps:$4 sm:$0xff]   ;;  %v6119_v58 = vld [vmem:[%s6801_s10 + $0x728] ss:$16 sps:$4 sm:$0xff]  }
 0x211   : > { %4312 = vmatprep.subr.bf16.mxu1 %v6064_v59  ;;  %v6122_v59 = vld [vmem:[%s6801_s10 + $0x928] ss:$16 sps:$4 sm:$0xff]  }
 0x213   : > { %4272 = vmatpush1.bf16.msra.mxu0 %v6059_v63  ;;  %v6127_v63 = vld [vmem:[%s6801_s10 + $0x74c] ss:$16 sps:$4 sm:$0xff]  }
 0x214   : > { %4313 = vmatpush1.bf16.msra.mxu1 %v6062_v0  ;;  %4323 = vmatprep.subr.bf16.mxu0 %v6067_v1  ;;  %v6130_v0 = vld [vmem:[%s6801_s10 + $0x94c] ss:$16 sps:$4 sm:$0xff]   ;;  %v6125_v1 = vld [vmem:[%s6801_s10 + $0x748] ss:$16 sps:$4 sm:$0xff]  }
 0x215   : > { %4364 = vmatprep.subr.bf16.mxu1 %v6070_v42  ;;  %v6128_v42 = vld [vmem:[%s6801_s10 + $0x948] ss:$16 sps:$4 sm:$0xff]  }
 0x216   : > { %4274 = vmatmul.mubr.bf16.vlgmr.msra.gmra.mrb[20].mxu0 %v6892_v8  ;;  %v6077_v8 = vld [vmem:[%s6801_s10 + $0x648] ss:$16 sps:$4 sm:$0xff]  }
 0x217   : > { %4315 = vmatmul.mubr.bf16.vlgmr.msra.gmra.mrb[20].mxu1 %v6978_v17  ;;  %4324 = vmatpush1.bf16.msra.mxu0 %v6065_v2  ;;  %v6080_v17 = vld [vmem:[%s6801_s10 + $0x848] ss:$16 sps:$4 sm:$0xff]   ;;  %v6133_v2 = vld [vmem:[%s6801_s10 + $0x76c] ss:$16 sps:$4 sm:$0xff]  }
 0x218   : > { %4365 = vmatpush1.bf16.msra.mxu1 %v6068_v3  ;;  %4325 = vmatprep.subr.bf16.mxu0 %v6073_v4  ;;  %v6136_v3 = vld [vmem:[%s6801_s10 + $0x96c] ss:$16 sps:$4 sm:$0xff]   ;;  %v6131_v4 = vld [vmem:[%s6801_s10 + $0x768] ss:$16 sps:$4 sm:$0xff]  }
 0x219   : > { %4366 = vmatprep.subr.bf16.mxu1 %v6076_v5  ;;  %4355 = vmatprep.mubr.bf16.mxu0 %v6934_v38  ;;  %v6086_v38 = vld [vmem:[%s6801_s10 + $0x868] ss:$16 sps:$4 sm:$0xff]  }
 0x21a   : > { %4396 = vmatprep.mubr.bf16.mxu1 %v6996_v25  ;;  %v6091_v25 = vld [vmem:[%s6801_s10 + $0x68c] ss:$16 sps:$4 sm:$0xff]   ;;  %v6134_v5 = vld [vmem:[%s6801_s10 + $0x968] ss:$16 sps:$4 sm:$0xff]  }
 0x21b   : > { %4326 = vmatpush1.bf16.msra.mxu0 %v6071_v6  ;;  %v6139_v6 = vld [vmem:[%s6801_s10 + $0x78c] ss:$16 sps:$4 sm:$0xff]  }
 0x21c   : > { %4367 = vmatpush1.bf16.msra.mxu1 %v6074_v9  ;;  %4327 = vmatprep.subr.bf16.mxu0 %v6079_v10  ;;  %v6142_v9 = vld [vmem:[%s6801_s10 + $0x98c] ss:$16 sps:$4 sm:$0xff]   ;;  %v6137_v10 = vld [vmem:[%s6801_s10 + $0x788] ss:$16 sps:$4 sm:$0xff]  }
 0x21d   : > { %4368 = vmatprep.subr.bf16.mxu1 %v6082_v11  ;;  %v6140_v11 = vld [vmem:[%s6801_s10 + $0x988] ss:$16 sps:$4 sm:$0xff]  }
 0x21f   : > { %4328 = vmatpush1.bf16.msra.mxu0 %v6077_v8  ;;  %v6145_v8 = vld [vmem:[%s6801_s10 + $0x7ac] ss:$16 sps:$4 sm:$0xff]  }
 0x220   : > { %4369 = vmatpush1.bf16.msra.mxu1 %v6080_v17  ;;  %4329 = vmatprep.subr.bf16.mxu0 %v6085_v48  ;;  %v6148_v17 = vld [vmem:[%s6801_s10 + $0x9ac] ss:$16 sps:$4 sm:$0xff]   ;;  %v6143_v48 = vld [vmem:[%s6801_s10 + $0x7a8] ss:$16 sps:$4 sm:$0xff]  }
 0x221   : > { %4370 = vmatprep.subr.bf16.mxu1 %v6088_v13  ;;  %v6146_v13 = vld [vmem:[%s6801_s10 + $0x9a8] ss:$16 sps:$4 sm:$0xff]  }
 0x223   : > { %4330 = vmatpush1.bf16.msra.mxu0 %v6083_v32  ;;  %v6151_v32 = vld [vmem:[%s6801_s10 + $0x7cc] ss:$16 sps:$4 sm:$0xff]  }
 0x224   : > { %4371 = vmatpush1.bf16.msra.mxu1 %v6086_v38  ;;  %4331 = vmatprep.subr.bf16.mxu0 %v6091_v25  ;;  %v6154_v38 = vld [vmem:[%s6801_s10 + $0x9cc] ss:$16 sps:$4 sm:$0xff]   ;;  %v6149_v25 = vld [vmem:[%s6801_s10 + $0x7c8] ss:$16 sps:$4 sm:$0xff]  }
 0x225   : > { %4372 = vmatprep.subr.bf16.mxu1 %v6094_v14  ;;  %v6152_v14 = vld [vmem:[%s6801_s10 + $0x9c8] ss:$16 sps:$4 sm:$0xff]  }
 0x227   : > { %4332 = vmatpush1.bf16.msra.mxu0 %v6089_v35  ;;  %v6157_v35 = vld [vmem:[%s6801_s10 + $0x7ec] ss:$16 sps:$4 sm:$0xff]  }
 0x228   : > { %4373 = vmatpush1.bf16.msra.mxu1 %v6092_v16  ;;  %4333 = vmatprep.subr.bf16.mxu0 %v6097_v19  ;;  %v6160_v16 = vld [vmem:[%s6801_s10 + $0x9ec] ss:$16 sps:$4 sm:$0xff]   ;;  %v6155_v19 = vld [vmem:[%s6801_s10 + $0x7e8] ss:$16 sps:$4 sm:$0xff]  }
 0x229   : > { %4374 = vmatprep.subr.bf16.mxu1 %v6100_v20  ;;  %v4029_v29 = vpop.f32.mrb[8].mxu0  ;;  %v6158_v20 = vld [vmem:[%s6801_s10 + $0x9e8] ss:$16 sps:$4 sm:$0xff]  }
 0x22a   : > { %v4070_v30 = vpop.f32.mrb[8].mxu1  ;;  %v4030_v31 = vadd.f32 %v4029_v29, %v7279_v12  ;;  %v4031_v33 = vpop.f32.mrb[9].mxu0  ;;  %v6109_v12 = vld [vmem:[%s6801_s10 + $0x6ec] ss:$16 sps:$4 sm:$0xff]  }
 0x22b   : > { %v4072_v36 = vpop.f32.mrb[9].mxu1  ;;  %v4032_v43 = vadd.f32 %v4031_v33, %v7283_v15  ;;  %v4033_v44 = vpop.f32.mrb[10].mxu0  ;;  %4334 = vmatpush1.bf16.msra.mxu0 %v6095_v21  ;;  %v6112_v15 = vld [vmem:[%s6801_s10 + $0x8ec] ss:$16 sps:$4 sm:$0xff]   ;;  %v6170_v33 = vld [vmem:[%s6801_s10 + $0xc28] ss:$16 sps:$4 sm:$0xff]  }
 0x22c   : > { %v4074_v62 = vpop.f32.mrb[10].mxu1  ;;  %4375 = vmatpush1.bf16.msra.mxu1 %v6098_v22  ;;  %v7353_v7 = vadd.f32 %v4070_v30, %v4030_v31  ;;  %v4034_v47 = vpop.f32.mrb[11].mxu0  ;;  %4335 = vmatprep.subr.bf16.mxu0 %v6103_v27  ;;  %v6163_v21 = vld [vmem:[%s6801_s10 + $0xa0c] ss:$16 sps:$4 sm:$0xff]   ;;  %v6161_v27 = vld [vmem:[%s6801_s10 + $0xa08] ss:$16 sps:$4 sm:$0xff]  }
 0x22d   : > { %v4075_v49 = vpop.f32.mrb[11].mxu1  ;;  %4376 = vmatprep.subr.bf16.mxu1 %v6106_v28  ;;  %v7357_v50 = vadd.f32 %v4072_v36, %v4032_v43  ;;  %v6166_v22 = vld [vmem:[%s6801_s10 + $0xc0c] ss:$16 sps:$4 sm:$0xff]   ;;  %v6164_v28 = vld [vmem:[%s6801_s10 + $0xc08] ss:$16 sps:$4 sm:$0xff]  }
 0x22e   : > { %v6169_v29 = vld [vmem:[%s6801_s10 + $0xa2c] ss:$16 sps:$4 sm:$0xff]   ;;  %v6167_v31 = vld [vmem:[%s6801_s10 + $0xa28] ss:$16 sps:$4 sm:$0xff]  }
 0x22f   : > { %4336 = vmatpush1.bf16.msra.mxu0 %v6101_v45  ;;  %v6172_v30 = vld [vmem:[%s6801_s10 + $0xc2c] ss:$16 sps:$4 sm:$0xff]   ;;  %v6179_v45 = vld [vmem:[%s6801_s10 + $0xa68] ss:$16 sps:$4 sm:$0xff]  }
 0x230   : > { %4377 = vmatpush1.bf16.msra.mxu1 %v6104_v46  ;;  %4337 = vmatprep.subr.bf16.mxu0 %v6109_v12  ;;  %v6175_v36 = vld [vmem:[%s6801_s10 + $0xa4c] ss:$16 sps:$4 sm:$0xff]   ;;  %v6185_v47 = vld [vmem:[%s6801_s10 + $0xa88] ss:$16 sps:$4 sm:$0xff]  }
 0x231   : > { %4378 = vmatprep.subr.bf16.mxu1 %v6112_v15  ;;  %v6178_v43 = vld [vmem:[%s6801_s10 + $0xc4c] ss:$16 sps:$4 sm:$0xff]   ;;  %v6188_v49 = vld [vmem:[%s6801_s10 + $0xc88] ss:$16 sps:$4 sm:$0xff]  }
 0x232   : > { %v6181_v44 = vld [vmem:[%s6801_s10 + $0xa6c] ss:$16 sps:$4 sm:$0xff]  }
 0x233   : > { %4338 = vmatpush1.bf16.msra.mxu0 %v6107_v52  ;;  %v6184_v62 = vld [vmem:[%s6801_s10 + $0xc6c] ss:$16 sps:$4 sm:$0xff]   ;;  %v6191_v52 = vld [vmem:[%s6801_s10 + $0xaa8] ss:$16 sps:$4 sm:$0xff]  }
 0x234   : > { %4379 = vmatpush1.bf16.msra.mxu1 %v6110_v51  ;;  %4339 = vmatprep.subr.bf16.mxu0 %v6115_v37  ;;  %v6190_v46 = vld [vmem:[%s6801_s10 + $0xc8c] ss:$16 sps:$4 sm:$0xff]   ;;  %v6194_v51 = vld [vmem:[%s6801_s10 + $0xca8] ss:$16 sps:$4 sm:$0xff]  }
 0x235   : > { %4380 = vmatprep.subr.bf16.mxu1 %v6118_v53  ;;  %v6193_v12 = vld [vmem:[%s6801_s10 + $0xaac] ss:$16 sps:$4 sm:$0xff]  }
 0x236   : > { %v6196_v15 = vld [vmem:[%s6801_s10 + $0xcac] ss:$16 sps:$4 sm:$0xff]  }
 0x237   : > { %4340 = vmatpush1.bf16.msra.mxu0 %v6113_v54  ;;  %v6199_v37 = vld [vmem:[%s6801_s10 + $0xacc] ss:$16 sps:$4 sm:$0xff]  }
 0x238   : > { %4381 = vmatpush1.bf16.msra.mxu1 %v6116_v55  ;;  %4341 = vmatprep.subr.bf16.mxu0 %v6121_v56  ;;  %v6202_v53 = vld [vmem:[%s6801_s10 + $0xccc] ss:$16 sps:$4 sm:$0xff]  }
 0x239   : > { %4382 = vmatprep.subr.bf16.mxu1 %v6124_v57 }
 0x23b   : > { %4342 = vmatpush1.bf16.msra.mxu0 %v6119_v58 }
 0x23c   : > { %4383 = vmatpush1.bf16.msra.mxu1 %v6122_v59  ;;  %4343 = vmatprep.subr.bf16.mxu0 %v6127_v63 }
 0x23d   : > { %4384 = vmatprep.subr.bf16.mxu1 %v6130_v0 }
 0x23f   : > { %4344 = vmatpush1.bf16.msra.mxu0 %v6125_v1  ;;  %v6197_v1 = vld [vmem:[%s6801_s10 + $0xac8] ss:$16 sps:$4 sm:$0xff]  }
 0x240   : > { %4385 = vmatpush1.bf16.msra.mxu1 %v6128_v42  ;;  %4345 = vmatprep.subr.bf16.mxu0 %v6133_v2  ;;  %v6200_v42 = vld [vmem:[%s6801_s10 + $0xcc8] ss:$16 sps:$4 sm:$0xff]  }
 0x241   : > { %4386 = vmatprep.subr.bf16.mxu1 %v6136_v3 }
 0x243   : > { %4346 = vmatpush1.bf16.msra.mxu0 %v6131_v4 }
 0x244   : > { %4387 = vmatpush1.bf16.msra.mxu1 %v6134_v5  ;;  %4347 = vmatprep.subr.bf16.mxu0 %v6139_v6  ;;  %v6203_v6 = vld [vmem:[%s6801_s10 + $0xae8] ss:$16 sps:$4 sm:$0xff]  }
 0x245   : > { %4388 = vmatprep.subr.bf16.mxu1 %v6142_v9  ;;  %v6206_v9 = vld [vmem:[%s6801_s10 + $0xce8] ss:$16 sps:$4 sm:$0xff]  }
 0x247   : > { %4348 = vmatpush1.bf16.msra.mxu0 %v6137_v10  ;;  %v6211_v10 = vld [vmem:[%s6801_s10 + $0xb0c] ss:$16 sps:$4 sm:$0xff]  }
 0x248   : > { %4389 = vmatpush1.bf16.msra.mxu1 %v6140_v11  ;;  %4349 = vmatprep.subr.bf16.mxu0 %v6145_v8  ;;  %v6214_v11 = vld [vmem:[%s6801_s10 + $0xd0c] ss:$16 sps:$4 sm:$0xff]   ;;  %v6209_v8 = vld [vmem:[%s6801_s10 + $0xb08] ss:$16 sps:$4 sm:$0xff]  }
 0x249   : > { %4390 = vmatprep.subr.bf16.mxu1 %v6148_v17  ;;  %v6212_v17 = vld [vmem:[%s6801_s10 + $0xd08] ss:$16 sps:$4 sm:$0xff]  }
 0x24b   : > { %4350 = vmatpush1.bf16.msra.mxu0 %v6143_v48  ;;  %v6217_v48 = vld [vmem:[%s6801_s10 + $0xb2c] ss:$16 sps:$4 sm:$0xff]  }
 0x24c   : > { %4391 = vmatpush1.bf16.msra.mxu1 %v6146_v13  ;;  %4351 = vmatprep.subr.bf16.mxu0 %v6151_v32  ;;  %v6220_v13 = vld [vmem:[%s6801_s10 + $0xd2c] ss:$16 sps:$4 sm:$0xff]   ;;  %v6215_v32 = vld [vmem:[%s6801_s10 + $0xb28] ss:$16 sps:$4 sm:$0xff]  }
 0x24d   : > { %4392 = vmatprep.subr.bf16.mxu1 %v6154_v38  ;;  %v6218_v38 = vld [vmem:[%s6801_s10 + $0xd28] ss:$16 sps:$4 sm:$0xff]  }
 0x24f   : > { %4352 = vmatpush1.bf16.msra.mxu0 %v6149_v25  ;;  %v6223_v25 = vld [vmem:[%s6801_s10 + $0xb4c] ss:$16 sps:$4 sm:$0xff]  }
 0x250   : > { %4393 = vmatpush1.bf16.msra.mxu1 %v6152_v14  ;;  %4353 = vmatprep.subr.bf16.mxu0 %v6157_v35  ;;  %v6226_v14 = vld [vmem:[%s6801_s10 + $0xd4c] ss:$16 sps:$4 sm:$0xff]   ;;  %v6221_v35 = vld [vmem:[%s6801_s10 + $0xb48] ss:$16 sps:$4 sm:$0xff]  }
 0x251   : > { %4394 = vmatprep.subr.bf16.mxu1 %v6160_v16  ;;  %v6224_v16 = vld [vmem:[%s6801_s10 + $0xd48] ss:$16 sps:$4 sm:$0xff]  }
 0x253   : > { %4354 = vmatpush1.bf16.msra.mxu0 %v6155_v19  ;;  %v6229_v19 = vld [vmem:[%s6801_s10 + $0xb6c] ss:$16 sps:$4 sm:$0xff]  }
 0x254   : > { %4395 = vmatpush1.bf16.msra.mxu1 %v6158_v20  ;;  %4405 = vmatprep.subr.bf16.mxu0 %v6163_v21  ;;  %v6232_v20 = vld [vmem:[%s6801_s10 + $0xd6c] ss:$16 sps:$4 sm:$0xff]   ;;  %v6227_v21 = vld [vmem:[%s6801_s10 + $0xb68] ss:$16 sps:$4 sm:$0xff]  }
 0x255   : > { %4446 = vmatprep.subr.bf16.mxu1 %v6166_v22  ;;  %v6230_v22 = vld [vmem:[%s6801_s10 + $0xd68] ss:$16 sps:$4 sm:$0xff]  }
 0x256   : > { %4356 = vmatmul.mubr.bf16.vlgmr.msra.gmra.mrb[24].mxu0 %v6982_v18  ;;  %v6173_v18 = vld [vmem:[%s6801_s10 + $0xa48] ss:$16 sps:$4 sm:$0xff]  }
 0x257   : > { %4397 = vmatmul.mubr.bf16.vlgmr.msra.gmra.mrb[24].mxu1 %v7070_v39  ;;  %4406 = vmatpush1.bf16.msra.mxu0 %v6161_v27  ;;  %v6176_v39 = vld [vmem:[%s6801_s10 + $0xc48] ss:$16 sps:$4 sm:$0xff]   ;;  %v6235_v27 = vld [vmem:[%s6801_s10 + $0xb8c] ss:$16 sps:$4 sm:$0xff]  }
 0x258   : > { %4447 = vmatpush1.bf16.msra.mxu1 %v6164_v28  ;;  %4407 = vmatprep.subr.bf16.mxu0 %v6169_v29  ;;  %v6238_v28 = vld [vmem:[%s6801_s10 + $0xd8c] ss:$16 sps:$4 sm:$0xff]   ;;  %v6233_v29 = vld [vmem:[%s6801_s10 + $0xb88] ss:$16 sps:$4 sm:$0xff]  }
 0x259   : > { %4448 = vmatprep.subr.bf16.mxu1 %v6172_v30  ;;  %4437 = vmatprep.mubr.bf16.mxu0 %v7000_v26  ;;  %v6182_v26 = vld [vmem:[%s6801_s10 + $0xc68] ss:$16 sps:$4 sm:$0xff]  }
 0x25a   : > { %4478 = vmatprep.mubr.bf16.mxu1 %v7086_v23  ;;  %v6187_v23 = vld [vmem:[%s6801_s10 + $0xa8c] ss:$16 sps:$4 sm:$0xff]   ;;  %v6236_v30 = vld [vmem:[%s6801_s10 + $0xd88] ss:$16 sps:$4 sm:$0xff]  }
 0x25b   : > { %4408 = vmatpush1.bf16.msra.mxu0 %v6167_v31  ;;  %v6241_v31 = vld [vmem:[%s6801_s10 + $0xbac] ss:$16 sps:$4 sm:$0xff]  }
 0x25c   : > { %4449 = vmatpush1.bf16.msra.mxu1 %v6170_v33  ;;  %4409 = vmatprep.subr.bf16.mxu0 %v6175_v36  ;;  %v6244_v33 = vld [vmem:[%s6801_s10 + $0xdac] ss:$16 sps:$4 sm:$0xff]   ;;  %v6239_v36 = vld [vmem:[%s6801_s10 + $0xba8] ss:$16 sps:$4 sm:$0xff]  }
 0x25d   : > { %4450 = vmatprep.subr.bf16.mxu1 %v6178_v43  ;;  %v6242_v43 = vld [vmem:[%s6801_s10 + $0xda8] ss:$16 sps:$4 sm:$0xff]  }
 0x25f   : > { %4410 = vmatpush1.bf16.msra.mxu0 %v6173_v18  ;;  %v6247_v18 = vld [vmem:[%s6801_s10 + $0xbcc] ss:$16 sps:$4 sm:$0xff]  }
 0x260   : > { %4451 = vmatpush1.bf16.msra.mxu1 %v6176_v39  ;;  %4411 = vmatprep.subr.bf16.mxu0 %v6181_v44  ;;  %v6250_v39 = vld [vmem:[%s6801_s10 + $0xdcc] ss:$16 sps:$4 sm:$0xff]   ;;  %v6245_v44 = vld [vmem:[%s6801_s10 + $0xbc8] ss:$16 sps:$4 sm:$0xff]  }
 0x261   : > { %4452 = vmatprep.subr.bf16.mxu1 %v6184_v62  ;;  %v6248_v62 = vld [vmem:[%s6801_s10 + $0xdc8] ss:$16 sps:$4 sm:$0xff]  }
 0x263   : > { %4412 = vmatpush1.bf16.msra.mxu0 %v6179_v45  ;;  %v6253_v45 = vld [vmem:[%s6801_s10 + $0xbec] ss:$16 sps:$4 sm:$0xff]  }
 0x264   : > { %4453 = vmatpush1.bf16.msra.mxu1 %v6182_v26  ;;  %4413 = vmatprep.subr.bf16.mxu0 %v6187_v23  ;;  %v6256_v26 = vld [vmem:[%s6801_s10 + $0xdec] ss:$16 sps:$4 sm:$0xff]   ;;  %v6251_v23 = vld [vmem:[%s6801_s10 + $0xbe8] ss:$16 sps:$4 sm:$0xff]  }
 0x265   : > { %4454 = vmatprep.subr.bf16.mxu1 %v6190_v46  ;;  %v6254_v46 = vld [vmem:[%s6801_s10 + $0xde8] ss:$16 sps:$4 sm:$0xff]  }
 0x267   : > { %4414 = vmatpush1.bf16.msra.mxu0 %v6185_v47  ;;  %v6259_v47 = vld [vmem:[%s6801_s10 + $0xe0c] ss:$16 sps:$4 sm:$0xff]  }
 0x268   : > { %4455 = vmatpush1.bf16.msra.mxu1 %v6188_v49  ;;  %4415 = vmatprep.subr.bf16.mxu0 %v6193_v12  ;;  %v6262_v49 = vld [vmem:[%s6801_s10 + $0x100c] ss:$16 sps:$4 sm:$0xff]   ;;  %v6257_v12 = vld [vmem:[%s6801_s10 + $0xe08] ss:$16 sps:$4 sm:$0xff]  }
 0x269   : > { %4456 = vmatprep.subr.bf16.mxu1 %v6196_v15  ;;  %v4111_v54 = vpop.f32.mrb[12].mxu0  ;;  %v6260_v15 = vld [vmem:[%s6801_s10 + $0x1008] ss:$16 sps:$4 sm:$0xff]  }
 0x26a   : > { %v4152_v55 = vpop.f32.mrb[12].mxu1  ;;  %v4112_v56 = vadd.f32 %v4111_v54, %v7353_v7  ;;  %v4113_v57 = vpop.f32.mrb[13].mxu0  ;;  %v6205_v7 = vld [vmem:[%s6801_s10 + $0xaec] ss:$16 sps:$4 sm:$0xff]  }
 0x26b   : > { %v4154_v58 = vpop.f32.mrb[13].mxu1  ;;  %v4114_v59 = vadd.f32 %v4113_v57, %v7357_v50  ;;  %v4115_v63 = vpop.f32.mrb[14].mxu0  ;;  %4416 = vmatpush1.bf16.msra.mxu0 %v6191_v52  ;;  %v6208_v50 = vld [vmem:[%s6801_s10 + $0xcec] ss:$16 sps:$4 sm:$0xff]  }
 0x26c   : > { %v4156_v0 = vpop.f32.mrb[14].mxu1  ;;  %4457 = vmatpush1.bf16.msra.mxu1 %v6194_v51  ;;  %v7427_v2 = vadd.f32 %v4152_v55, %v4112_v56  ;;  %v4116_v3 = vpop.f32.mrb[15].mxu0  ;;  %4417 = vmatprep.subr.bf16.mxu0 %v6199_v37  ;;  %v6265_v52 = vld [vmem:[%s6801_s10 + $0xe2c] ss:$16 sps:$4 sm:$0xff]   ;;  %v6263_v37 = vld [vmem:[%s6801_s10 + $0xe28] ss:$16 sps:$4 sm:$0xff]  }
 0x26d   : > { %v4157_v4 = vpop.f32.mrb[15].mxu1  ;;  %4458 = vmatprep.subr.bf16.mxu1 %v6202_v53  ;;  %v7431_v5 = vadd.f32 %v4154_v58, %v4114_v59  ;;  %v6268_v51 = vld [vmem:[%s6801_s10 + $0x102c] ss:$16 sps:$4 sm:$0xff]   ;;  %v6266_v53 = vld [vmem:[%s6801_s10 + $0x1028] ss:$16 sps:$4 sm:$0xff]  }
 0x26e   : > { %v6271_v54 = vld [vmem:[%s6801_s10 + $0xe4c] ss:$16 sps:$4 sm:$0xff]   ;;  %v6275_v58 = vld [vmem:[%s6801_s10 + $0xe68] ss:$16 sps:$4 sm:$0xff]  }
 0x26f   : > { %4418 = vmatpush1.bf16.msra.mxu0 %v6197_v1  ;;  %v6274_v55 = vld [vmem:[%s6801_s10 + $0x104c] ss:$16 sps:$4 sm:$0xff]   ;;  %v6281_v63 = vld [vmem:[%s6801_s10 + $0xe88] ss:$16 sps:$4 sm:$0xff]  }
 0x270   : > { %4459 = vmatpush1.bf16.msra.mxu1 %v6200_v42  ;;  %4419 = vmatprep.subr.bf16.mxu0 %v6205_v7  ;;  %v6277_v56 = vld [vmem:[%s6801_s10 + $0xe6c] ss:$16 sps:$4 sm:$0xff]   ;;  %v6284_v0 = vld [vmem:[%s6801_s10 + $0x1088] ss:$16 sps:$4 sm:$0xff]  }
 0x271   : > { %4460 = vmatprep.subr.bf16.mxu1 %v6208_v50  ;;  %v6280_v57 = vld [vmem:[%s6801_s10 + $0x106c] ss:$16 sps:$4 sm:$0xff]   ;;  %v6287_v3 = vld [vmem:[%s6801_s10 + $0xea8] ss:$16 sps:$4 sm:$0xff]  }
 0x272   : > { %v6286_v59 = vld [vmem:[%s6801_s10 + $0x108c] ss:$16 sps:$4 sm:$0xff]   ;;  %v6290_v4 = vld [vmem:[%s6801_s10 + $0x10a8] ss:$16 sps:$4 sm:$0xff]  }
 0x273   : > { %4420 = vmatpush1.bf16.msra.mxu0 %v6203_v6  ;;  %v6289_v1 = vld [vmem:[%s6801_s10 + $0xeac] ss:$16 sps:$4 sm:$0xff]   ;;  %v299_v6 = vld [vmem:[#allocation2] sm:$0xff] }
 0x274   : > { %4461 = vmatpush1.bf16.msra.mxu1 %v6206_v9  ;;  %4421 = vmatprep.subr.bf16.mxu0 %v6211_v10  ;;  %v6292_v42 = vld [vmem:[%s6801_s10 + $0x10ac] ss:$16 sps:$4 sm:$0xff]  }
 0x275   : > { %4462 = vmatprep.subr.bf16.mxu1 %v6214_v11  ;;  %v6295_v7 = vld [vmem:[%s6801_s10 + $0xecc] ss:$16 sps:$4 sm:$0xff]  }
 0x276   : > { %v6298_v50 = vld [vmem:[%s6801_s10 + $0x10cc] ss:$16 sps:$4 sm:$0xff]  }
 0x277   : > { %4422 = vmatpush1.bf16.msra.mxu0 %v6209_v8  ;;  %v300_v8 = vld [vmem:[#allocation2 + $0x8] sm:$0xff] }
 0x278   : > { %4463 = vmatpush1.bf16.msra.mxu1 %v6212_v17  ;;  %4423 = vmatprep.subr.bf16.mxu0 %v6217_v48 }
 0x279   : > { %4464 = vmatprep.subr.bf16.mxu1 %v6220_v13 }
 0x27b   : > { %4424 = vmatpush1.bf16.msra.mxu0 %v6215_v32 }
 0x27c   : > { %4465 = vmatpush1.bf16.msra.mxu1 %v6218_v38  ;;  %4425 = vmatprep.subr.bf16.mxu0 %v6223_v25  ;;  %v6293_v25 = vld [vmem:[%s6801_s10 + $0xec8] ss:$16 sps:$4 sm:$0xff]  }
 0x27d   : > { %4466 = vmatprep.subr.bf16.mxu1 %v6226_v14  ;;  %v6296_v14 = vld [vmem:[%s6801_s10 + $0x10c8] ss:$16 sps:$4 sm:$0xff]  }
 0x27f   : > { %4426 = vmatpush1.bf16.msra.mxu0 %v6221_v35 }
 0x280   : > { %4467 = vmatpush1.bf16.msra.mxu1 %v6224_v16  ;;  %4427 = vmatprep.subr.bf16.mxu0 %v6229_v19  ;;  %v6301_v19 = vld [vmem:[%s6801_s10 + $0xeec] ss:$16 sps:$4 sm:$0xff]  }
 0x281   : > { %4468 = vmatprep.subr.bf16.mxu1 %v6232_v20  ;;  %v6304_v20 = vld [vmem:[%s6801_s10 + $0x10ec] ss:$16 sps:$4 sm:$0xff]  }
 0x283   : > { %4428 = vmatpush1.bf16.msra.mxu0 %v6227_v21  ;;  %v6299_v21 = vld [vmem:[%s6801_s10 + $0xee8] ss:$16 sps:$4 sm:$0xff]  }
 0x284   : > { %4469 = vmatpush1.bf16.msra.mxu1 %v6230_v22  ;;  %4429 = vmatprep.subr.bf16.mxu0 %v6235_v27  ;;  %v6302_v22 = vld [vmem:[%s6801_s10 + $0x10e8] ss:$16 sps:$4 sm:$0xff]   ;;  %v6307_v27 = vld [vmem:[%s6801_s10 + $0xf0c] ss:$16 sps:$4 sm:$0xff]  }
 0x285   : > { %4470 = vmatprep.subr.bf16.mxu1 %v6238_v28  ;;  %v6310_v28 = vld [vmem:[%s6801_s10 + $0x110c] ss:$16 sps:$4 sm:$0xff]  }
 0x287   : > { %4430 = vmatpush1.bf16.msra.mxu0 %v6233_v29  ;;  %v6305_v29 = vld [vmem:[%s6801_s10 + $0xf08] ss:$16 sps:$4 sm:$0xff]  }
 0x288   : > { %4471 = vmatpush1.bf16.msra.mxu1 %v6236_v30  ;;  %4431 = vmatprep.subr.bf16.mxu0 %v6241_v31  ;;  %v6308_v30 = vld [vmem:[%s6801_s10 + $0x1108] ss:$16 sps:$4 sm:$0xff]   ;;  %v6313_v31 = vld [vmem:[%s6801_s10 + $0xf2c] ss:$16 sps:$4 sm:$0xff]  }
 0x289   : > { %4472 = vmatprep.subr.bf16.mxu1 %v6244_v33  ;;  %v6316_v33 = vld [vmem:[%s6801_s10 + $0x112c] ss:$16 sps:$4 sm:$0xff]  }
 0x28b   : > { %4432 = vmatpush1.bf16.msra.mxu0 %v6239_v36  ;;  %v6311_v36 = vld [vmem:[%s6801_s10 + $0xf28] ss:$16 sps:$4 sm:$0xff]  }
 0x28c   : > { %4473 = vmatpush1.bf16.msra.mxu1 %v6242_v43  ;;  %4433 = vmatprep.subr.bf16.mxu0 %v6247_v18  ;;  %v6314_v43 = vld [vmem:[%s6801_s10 + $0x1128] ss:$16 sps:$4 sm:$0xff]   ;;  %v6319_v18 = vld [vmem:[%s6801_s10 + $0xf4c] ss:$16 sps:$4 sm:$0xff]  }
 0x28d   : > { %4474 = vmatprep.subr.bf16.mxu1 %v6250_v39  ;;  %v6322_v39 = vld [vmem:[%s6801_s10 + $0x114c] ss:$16 sps:$4 sm:$0xff]  }
 0x28f   : > { %4434 = vmatpush1.bf16.msra.mxu0 %v6245_v44  ;;  %v6317_v44 = vld [vmem:[%s6801_s10 + $0xf48] ss:$16 sps:$4 sm:$0xff]  }
 0x290   : > { %4475 = vmatpush1.bf16.msra.mxu1 %v6248_v62  ;;  %4435 = vmatprep.subr.bf16.mxu0 %v6253_v45  ;;  %v6320_v62 = vld [vmem:[%s6801_s10 + $0x1148] ss:$16 sps:$4 sm:$0xff]   ;;  %v6325_v45 = vld [vmem:[%s6801_s10 + $0xf6c] ss:$16 sps:$4 sm:$0xff]  }
 0x291   : > { %4476 = vmatprep.subr.bf16.mxu1 %v6256_v26  ;;  %v6328_v26 = vld [vmem:[%s6801_s10 + $0x116c] ss:$16 sps:$4 sm:$0xff]  }
 0x293   : > { %4436 = vmatpush1.bf16.msra.mxu0 %v6251_v23  ;;  %v6323_v23 = vld [vmem:[%s6801_s10 + $0xf68] ss:$16 sps:$4 sm:$0xff]  }
 0x294   : > { %4477 = vmatpush1.bf16.msra.mxu1 %v6254_v46  ;;  %4487 = vmatprep.subr.bf16.mxu0 %v6259_v47  ;;  %v6326_v46 = vld [vmem:[%s6801_s10 + $0x1168] ss:$16 sps:$4 sm:$0xff]   ;;  %v6331_v47 = vld [vmem:[%s6801_s10 + $0xf8c] ss:$16 sps:$4 sm:$0xff]  }
 0x295   : > { %4528 = vmatprep.subr.bf16.mxu1 %v6262_v49  ;;  %v6334_v49 = vld [vmem:[%s6801_s10 + $0x118c] ss:$16 sps:$4 sm:$0xff]  }
 0x296   : > { %4438 = vmatmul.mubr.bf16.vlgmr.msra.gmra.mrb[28].mxu0 %v7074_v40  ;;  %v6269_v40 = vld [vmem:[%s6801_s10 + $0xe48] ss:$16 sps:$4 sm:$0xff]  }
 0x297   : > { %4479 = vmatmul.mubr.bf16.vlgmr.msra.gmra.mrb[28].mxu1 %v7159_v60  ;;  %4488 = vmatpush1.bf16.msra.mxu0 %v6257_v12  ;;  %v6272_v60 = vld [vmem:[%s6801_s10 + $0x1048] ss:$16 sps:$4 sm:$0xff]  }
 0x298   : > { %4529 = vmatpush1.bf16.msra.mxu1 %v6260_v15  ;;  %4489 = vmatprep.subr.bf16.mxu0 %v6265_v52  ;;  %v6329_v12 = vld [vmem:[%s6801_s10 + $0xf88] ss:$16 sps:$4 sm:$0xff]   ;;  %v6337_v52 = vld [vmem:[%s6801_s10 + $0xfac] ss:$16 sps:$4 sm:$0xff]  }
 0x299   : > { %4530 = vmatprep.subr.bf16.mxu1 %v6268_v51  ;;  %4519 = vmatprep.mubr.bf16.mxu0 %v7090_v24  ;;  %v6278_v24 = vld [vmem:[%s6801_s10 + $0x1068] ss:$16 sps:$4 sm:$0xff]   ;;  %v6340_v51 = vld [vmem:[%s6801_s10 + $0x11ac] ss:$16 sps:$4 sm:$0xff]  }
 0x29a   : > { %4560 = vmatprep.mubr.bf16.mxu1 %v7173_v41  ;;  %v6283_v41 = vld [vmem:[%s6801_s10 + $0xe8c] ss:$16 sps:$4 sm:$0xff]   ;;  %v6332_v15 = vld [vmem:[%s6801_s10 + $0x1188] ss:$16 sps:$4 sm:$0xff]  }
 0x29b   : > { %4490 = vmatpush1.bf16.msra.mxu0 %v6263_v37  ;;  %v6335_v37 = vld [vmem:[%s6801_s10 + $0xfa8] ss:$16 sps:$4 sm:$0xff]  }
 0x29c   : > { %4531 = vmatpush1.bf16.msra.mxu1 %v6266_v53  ;;  %4491 = vmatprep.subr.bf16.mxu0 %v6271_v54  ;;  %v6338_v53 = vld [vmem:[%s6801_s10 + $0x11a8] ss:$16 sps:$4 sm:$0xff]   ;;  %v6343_v54 = vld [vmem:[%s6801_s10 + $0xfcc] ss:$16 sps:$4 sm:$0xff]  }
 0x29d   : > { %4532 = vmatprep.subr.bf16.mxu1 %v6274_v55  ;;  %v6346_v55 = vld [vmem:[%s6801_s10 + $0x11cc] ss:$16 sps:$4 sm:$0xff]  }
 0x29f   : > { %4492 = vmatpush1.bf16.msra.mxu0 %v6269_v40  ;;  %v6341_v40 = vld [vmem:[%s6801_s10 + $0xfc8] ss:$16 sps:$4 sm:$0xff]  }
 0x2a0   : > { %4533 = vmatpush1.bf16.msra.mxu1 %v6272_v60  ;;  %4493 = vmatprep.subr.bf16.mxu0 %v6277_v56  ;;  %v6344_v60 = vld [vmem:[%s6801_s10 + $0x11c8] ss:$16 sps:$4 sm:$0xff]   ;;  %v6349_v56 = vld [vmem:[%s6801_s10 + $0xfec] ss:$16 sps:$4 sm:$0xff]  }
 0x2a1   : > { %4534 = vmatprep.subr.bf16.mxu1 %v6280_v57  ;;  %v6352_v57 = vld [vmem:[%s6801_s10 + $0x11ec] ss:$16 sps:$4 sm:$0xff]  }
 0x2a3   : > { %4494 = vmatpush1.bf16.msra.mxu0 %v6275_v58  ;;  %v6347_v58 = vld [vmem:[%s6801_s10 + $0xfe8] ss:$16 sps:$4 sm:$0xff]  }
 0x2a4   : > { %4535 = vmatpush1.bf16.msra.mxu1 %v6278_v24  ;;  %4495 = vmatprep.subr.bf16.mxu0 %v6283_v41  ;;  %v6350_v24 = vld [vmem:[%s6801_s10 + $0x11e8] ss:$16 sps:$4 sm:$0xff]  }
 0x2a5   : > { %4536 = vmatprep.subr.bf16.mxu1 %v6286_v59 }
 0x2a7   : > { %4496 = vmatpush1.bf16.msra.mxu0 %v6281_v63 }
 0x2a8   : > { %4537 = vmatpush1.bf16.msra.mxu1 %v6284_v0  ;;  %4497 = vmatprep.subr.bf16.mxu0 %v6289_v1 }
 0x2a9   : > { %4538 = vmatprep.subr.bf16.mxu1 %v6292_v42  ;;  %v4193_v9 = vpop.f32.mrb[16].mxu0 }
 0x2aa   : > { %v7497_v10 = vpop.f32.mrb[16].mxu1  ;;  %v4194_v11 = vadd.f32 %v4193_v9, %v7427_v2  ;;  %v4195_v17 = vpop.f32.mrb[17].mxu0 }
 0x2ab   : > { %v7500_v48 = vpop.f32.mrb[17].mxu1  ;;  %v4196_v13 = vadd.f32 %v4195_v17, %v7431_v5  ;;  %v4197_v32 = vpop.f32.mrb[18].mxu0  ;;  %4498 = vmatpush1.bf16.msra.mxu0 %v6287_v3 }
 0x2ac   : > { %v4238_v38 = vpop.f32.mrb[18].mxu1  ;;  %4539 = vmatpush1.bf16.msra.mxu1 %v6290_v4  ;;  %v4569_v35 = vadd.f32 %v4194_v11, %v299_v6  ;;  %v4198_v16 = vpop.f32.mrb[19].mxu0  ;;  %4499 = vmatprep.subr.bf16.mxu0 %v6295_v7 }
 0x2ad   : > { %v4239_v2 = vpop.f32.mrb[19].mxu1  ;;  %4540 = vmatprep.subr.bf16.mxu1 %v6298_v50  ;;  %v4570_v5 = vadd.f32 %v4196_v13, %v300_v8 }
 0x2ae   : > { %4573 = vst [vmem:[#allocation2] sm:$0xff] %v4569_v35 }
 0x2af   : > { %4574 = vst [vmem:[#allocation2 + $0x8] sm:$0xff] %v4570_v5  ;;  %4500 = vmatpush1.bf16.msra.mxu0 %v6293_v25 }
 0x2b0   : > { %4541 = vmatpush1.bf16.msra.mxu1 %v6296_v14  ;;  %4501 = vmatprep.subr.bf16.mxu0 %v6301_v19 }
 0x2b1   : > { %4542 = vmatprep.subr.bf16.mxu1 %v6304_v20 }
 0x2b3   : > { %4502 = vmatpush1.bf16.msra.mxu0 %v6299_v21 }
 0x2b4   : > { %4543 = vmatpush1.bf16.msra.mxu1 %v6302_v22  ;;  %4503 = vmatprep.subr.bf16.mxu0 %v6307_v27 }
 0x2b5   : > { %4544 = vmatprep.subr.bf16.mxu1 %v6310_v28 }
 0x2b7   : > { %4504 = vmatpush1.bf16.msra.mxu0 %v6305_v29 }
 0x2b8   : > { %4545 = vmatpush1.bf16.msra.mxu1 %v6308_v30  ;;  %4505 = vmatprep.subr.bf16.mxu0 %v6313_v31 }
 0x2b9   : > { %4546 = vmatprep.subr.bf16.mxu1 %v6316_v33 }
 0x2bb   : > { %4506 = vmatpush1.bf16.msra.mxu0 %v6311_v36 }
 0x2bc   : > { %4547 = vmatpush1.bf16.msra.mxu1 %v6314_v43  ;;  %4507 = vmatprep.subr.bf16.mxu0 %v6319_v18 }
 0x2bd   : > { %4548 = vmatprep.subr.bf16.mxu1 %v6322_v39  ;;  %v301_v39 = vld [vmem:[#allocation2 + $0x10] sm:$0xff] }
 0x2bf   : > { %4508 = vmatpush1.bf16.msra.mxu0 %v6317_v44 }
 0x2c0   : > { %4549 = vmatpush1.bf16.msra.mxu1 %v6320_v62  ;;  %4509 = vmatprep.subr.bf16.mxu0 %v6325_v45 }
 0x2c1   : > { %4550 = vmatprep.subr.bf16.mxu1 %v6328_v26 }
 0x2c3   : > { %4510 = vmatpush1.bf16.msra.mxu0 %v6323_v23  ;;  %v302_v23 = vld [vmem:[#allocation2 + $0x18] sm:$0xff] }
 0x2c4   : > { %4551 = vmatpush1.bf16.msra.mxu1 %v6326_v46  ;;  %4511 = vmatprep.subr.bf16.mxu0 %v6331_v47 }
 0x2c5   : > { %4552 = vmatprep.subr.bf16.mxu1 %v6334_v49 }
 0x2c7   : > { %4512 = vmatpush1.bf16.msra.mxu0 %v6329_v12 }
 0x2c8   : > { %4553 = vmatpush1.bf16.msra.mxu1 %v6332_v15  ;;  %4513 = vmatprep.subr.bf16.mxu0 %v6337_v52  ;;  %v4587_v52 = vlaneseq (!%p5367_p13) }
 0x2c9   : > { %4554 = vmatprep.subr.bf16.mxu1 %v6340_v51 }
 0x2ca   : > { %v4588_v51 = vshrl.u32 (!%p5367_p13), %v4587_v52, 7 }
 0x2cb   : > { %4514 = vmatpush1.bf16.msra.mxu0 %v6335_v37  ;;  %v4585_v37 = vld [vmem:[#allocation8] sm:$0xf] (!%p5367_p13) }
 0x2cc   : > { %4555 = vmatpush1.bf16.msra.mxu1 %v6338_v53  ;;  %4515 = vmatprep.subr.bf16.mxu0 %v6343_v54  ;;  %v4611_v53 = vld [vmem:[#allocation9] sm:$0xf] (!%p5367_p13)  ;;  %v4589_v54 = vsub.s32 (!%p5367_p13), 0, %v4588_v51 }
 0x2cd   : > { %4556 = vmatprep.subr.bf16.mxu1 %v6346_v55  ;;  %v4593_v55 = vsub.s32 (!%p5367_p13), 1, %v4588_v51 }
 0x2cf   : > { %4516 = vmatpush1.bf16.msra.mxu0 %v6341_v40  ;;  %v4597_v40 = vsub.s32 (!%p5367_p13), 2, %v4588_v51 }
 0x2d0   : > { %4557 = vmatpush1.bf16.msra.mxu1 %v6344_v60  ;;  %4517 = vmatprep.subr.bf16.mxu0 %v6349_v56  ;;  %v4601_v60 = vsub.s32 (!%p5367_p13), 3, %v4588_v51  ;;  %v4581_v56 = vld [vmem:[#allocation2] sm:$0xff] (!%p5367_p13) }
 0x2d1   : > { %4558 = vmatprep.subr.bf16.mxu1 %v6352_v57  ;;  %v4582_v57 = vld [vmem:[#allocation2 + $0x8] sm:$0xff] (!%p5367_p13) }
 0x2d3   : > { %4518 = vmatpush1.bf16.msra.mxu0 %v6347_v58  ;;  %v4590_v58 = vrot.slane (!%p5367_p13), %v4585_v37, %v4589_v54 }
 0x2d4   : > { %4559 = vmatpush1.bf16.msra.mxu1 %v6350_v24  ;;  %v4616_v24 = vrot.slane (!%p5367_p13), %v4611_v53, %v4589_v54 }
 0x2d6   : > { %4520 = vmatmul.mubr.bf16.vlgmr.msra.gmra.mrb[32].mxu0 %v7163_v61 }
 0x2d7   : > { %4561 = vmatmul.mubr.bf16.vlgmr.msra.gmra.mrb[32].mxu1 %v7247_v34 }
 0x2e9   : > { %v4275_v41 = vpop.f32.mrb[20].mxu0 }
 0x2ea   : > { %v4316_v59 = vpop.f32.mrb[20].mxu1  ;;  %v4276_v63 = vadd.f32 %v4275_v41, %v7497_v10  ;;  %v4277_v0 = vpop.f32.mrb[21].mxu0  ;;  %v4594_v41 = vrot.slane (!%p5367_p13), %v4585_v37, %v4593_v55 }
 0x2eb   : > { %v4318_v1 = vpop.f32.mrb[21].mxu1  ;;  %v4278_v42 = vadd.f32 %v4277_v0, %v7500_v48  ;;  %v4279_v3 = vpop.f32.mrb[22].mxu0 }
 0x2ec   : > { %v4320_v4 = vpop.f32.mrb[22].mxu1  ;;  %v4317_v7 = vadd.f32 %v4316_v59, %v4276_v63  ;;  %v4280_v50 = vpop.f32.mrb[23].mxu0  ;;  %v4620_v59 = vrot.slane (!%p5367_p13), %v4611_v53, %v4593_v55  ;;  %v4602_v3 = vrot.slane (!%p5367_p13), %v4585_v37, %v4601_v60 }
 0x2ed   : > { %v4321_v6 = vpop.f32.mrb[23].mxu1  ;;  %v4319_v9 = vadd.f32 %v4318_v1, %v4278_v42  ;;  %v4598_v1 = vrot.slane (!%p5367_p13), %v4585_v37, %v4597_v40  ;;  %v4624_v42 = vrot.slane (!%p5367_p13), %v4611_v53, %v4597_v40  ;;  %v4628_v4 = vrot.slane (!%p5367_p13), %v4611_v53, %v4601_v60 }
 0x2ee   : > { %v4608_v50 = vmul.f32 (!%p5367_p13), %v4594_v41, %v4582_v57 }
 0x329   : > { %v4357_v11 = vpop.f32.mrb[24].mxu0 }
 0x32a   : > { %v4398_v8 = vpop.f32.mrb[24].mxu1  ;;  %v4358_v17 = vadd.f32 %v4357_v11, %v4317_v7  ;;  %v4359_v61 = vpop.f32.mrb[25].mxu0  ;;  %v4607_v7 = vmul.f32 (!%p5367_p13), %v4590_v58, %v4581_v56 }
 0x32b   : > { %v4400_v13 = vpop.f32.mrb[25].mxu1  ;;  %v4360_v34 = vadd.f32 %v4359_v61, %v4319_v9  ;;  %v4361_v32 = vpop.f32.mrb[26].mxu0 }
 0x32c   : > { %v4402_v38 = vpop.f32.mrb[26].mxu1  ;;  %v4399_v25 = vadd.f32 %v4398_v8, %v4358_v17  ;;  %v4362_v10 = vpop.f32.mrb[27].mxu0  ;;  %v4633_v11 = vadd.f32 (!%p5367_p13), %v4616_v24, %v4607_v7  ;;  %v4634_v8 = vadd.f32 (!%p5367_p13), %v4620_v59, %v4608_v50 }
 0x32d   : > { %v4403_v14 = vpop.f32.mrb[27].mxu1  ;;  %v4401_v35 = vadd.f32 %v4400_v13, %v4360_v34 }
 0x32e   : > { %v4637_v13 = vmax.f32 (!%p5367_p13), %v4633_v11, 0.0  ;;  %v4638_v34 = vmax.f32 (!%p5367_p13), %v4634_v8, 0.0 }
 0x330   : > { %4641 = vst [vmem:[#allocation11] sm:$0xff] (!%p5367_p13), %v4637_v13  ;;  %4642 = vst [vmem:[#allocation11 + $0x8] sm:$0xff] (!%p5367_p13), %v4638_v34 }
 0x369   : > { %v4439_v16 = vpop.f32.mrb[28].mxu0 }
 0x36a   : > { %v4480_v48 = vpop.f32.mrb[28].mxu1  ;;  %v4440_v2 = vadd.f32 %v4439_v16, %v4399_v25  ;;  %v4441_v19 = vpop.f32.mrb[29].mxu0 }
 0x36b   : > { %v4482_v20 = vpop.f32.mrb[29].mxu1  ;;  %v4442_v5 = vadd.f32 %v4441_v19, %v4401_v35  ;;  %v4443_v21 = vpop.f32.mrb[30].mxu0 }
 0x36c   : > { %v4484_v22 = vpop.f32.mrb[30].mxu1  ;;  %v4481_v27 = vadd.f32 %v4480_v48, %v4440_v2  ;;  %v4444_v28 = vpop.f32.mrb[31].mxu0 }
 0x36d   : > { %v4485_v29 = vpop.f32.mrb[31].mxu1  ;;  %v4483_v30 = vadd.f32 %v4482_v20, %v4442_v5 }
 0x3a9   : > { %v4521_v31 = vpop.f32.mrb[32].mxu0 }
 0x3aa   : > { %v4562_v33 = vpop.f32.mrb[32].mxu1  ;;  %v4522_v36 = vadd.f32 %v4521_v31, %v4481_v27  ;;  %v4523_v43 = vpop.f32.mrb[33].mxu0 }
 0x3ab   : > { %v4564_v18 = vpop.f32.mrb[33].mxu1  ;;  %v4524_v44 = vadd.f32 %v4523_v43, %v4483_v30  ;;  %v4525_v62 = vpop.f32.mrb[34].mxu0  ;;  %4580 = sbr.rel (%p5367_p13) target bundleno = 960 (0x3c0), region = 60 }
 0x3ac   : > { %v4566_v45 = vpop.f32.mrb[34].mxu1  ;;  %v4563_v26 = vadd.f32 %v4562_v33, %v4522_v36  ;;  %v4526_v46 = vpop.f32.mrb[35].mxu0 }
 0x3ad   : > { %v4567_v47 = vpop.f32.mrb[35].mxu1  ;;  %v4565_v49 = vadd.f32 %v4564_v18, %v4524_v44 }
 0x3ae   : > { %v4571_v12 = vadd.f32 %v4563_v26, %v301_v39 }
 0x3af   : > { %v4572_v15 = vadd.f32 %v4565_v49, %v302_v23 }
 0x3b0   : > { %4575 = vst [vmem:[#allocation2 + $0x10] sm:$0xff] %v4571_v12 }
 0x3b1   : > { %4576 = vst [vmem:[#allocation2 + $0x18] sm:$0xff] %v4572_v15 }
 0x3b7   : > { %v4583_v63 = vld [vmem:[#allocation2 + $0x10] sm:$0xff] }
 0x3b8   : > { %v4584_v0 = vld [vmem:[#allocation2 + $0x18] sm:$0xff]  ;;  %v4609_v6 = vmul.f32 %v4598_v1, %v4583_v63 }
 0x3b9   : > { %v4610_v9 = vmul.f32 %v4602_v3, %v4584_v0 }
 0x3ba   : > { %v4635_v17 = vadd.f32 %v4624_v42, %v4609_v6 }
 0x3bb   : > { %v4636_v61 = vadd.f32 %v4628_v4, %v4610_v9 }
 0x3bc   : > { %v4639_v32 = vmax.f32 %v4635_v17, 0.0 }
 0x3bd   : > { %v4640_v38 = vmax.f32 %v4636_v61, 0.0 }
 0x3be   : > { %4643 = vst [vmem:[#allocation11 + $0x10] sm:$0xff] %v4639_v32 }
 0x3bf   : > { %4644 = vst [vmem:[#allocation11 + $0x18] sm:$0xff] %v4640_v38 }
 0x3c0 PF: > { %p5415_p2 = scmp.eq.s32.totalorder %s6625_s21, 1  ;;  %s6570_s18 = smov [#allocation11]  }
 0x3c1   : > { %s4655_s22 = sshll.u32 %s6570_s18, 4  ;;  %s4656_s22 = int_to_ptr.vmem [resolvable:$true] %s4655_s22 }
 0x3c2   : > { %s6469_s23 = scalar_lea.vmem %s4656_s22, 512  ;;  %p6476_p8 = scmp.lt.s32.totalorder %s4656_s22, %s4656_s22 }
 0x3c3   : > { %p6470_p3 = scmp.ne.s32.totalorder %s4656_s22, %s6469_s23  ;;  %p6477_p1 = scmp.lt.s32.totalorder %s6469_s23, %s6469_s23 }
 0x3c5   : > { %p6471_p0 = pnand %p6470_p3, %p5415_p2  ;;  %p6478_p12 = por %p6477_p1, %p6476_p8 }
 0x3c7   : > { %p6472_p6 = pneg %p6471_p0 }
 0x3c9   : > { %p6479_p9 = pnand %p6478_p12, %p6472_p6 }
 0x3cb   : > { %6482 = shalt.err (!%p6479_p9)
}
 0x3cc   : > { %s6483_s24 = scalar_lea.hbm %s7591_s4, 512 }
 0x3cd   : > { %p6484_p7 = scmp.ne.s32.totalorder %s7591_s4, %s6483_s24  ;;  %p6489_p10 = scmp.lt.u32.totalorder %s6483_s24, %s7591_s4 }
 0x3cf   : > { %p6485_p4 = pnand %p6484_p7, %p5415_p2 }
 0x3d1   : > { %p6486_p5 = pneg %p6485_p4 }
 0x3d3   : > { %p6491_p11 = pnand %p6489_p10, %p6486_p5 }
 0x3d5   : > { %6494 = shalt.err (!%p6491_p11)
}
 0x3d6   : > { %5393 = dma.vmem_to_hbm [thread:$0]  (%p5415_p2), %s4656_s22, 512, %s7591_s4, [#allocation5]  }
 0x3d7   : > { %6536 = dma.done.wait (%p5415_p2), [#allocation5], 512  }
 0x3d8   : > { %6538 = vsyncadd (%p5415_p2), [#allocation5], 4294966784 }
 0x3d9 PF: > { %s22_s20 = sadd.s32 1, %s6561_s20   ;;  %s7605_s15 = smov %s6545_s16 }
 0x3da   : > { %p19_p13 = scmp.ge.s32.totalorder %s22_s20, 4   ;;  %s7606_s16 = smov %s6549_s17 }
 0x3db   : > { %s7607_s17 = smov %s6718_s12  ;;  %s7608_s18 = smov %s6557_s19 }
 0x3dc   : > { %s7609_s19 = smov %s7611_s7  ;;  %21 = sbr.rel (!%p19_p13) target bundleno = 8 (0x8), region = 103 }
 0x3e3   :  { %4668 = vsyncpa [#allocation4], 1 }
 0x3e4   :  { %4670 = vsyncpa [#allocation4 + $0x1], 1 }
 0x3e5   :  { %4671 = vsyncpa [#allocation7], 1 }
 0x3e6   :  { %4673 = vsyncpa [#allocation7 + $0x1], 1 }
 0x3e7   :  { %4674 = vsyncpa [#allocation10], 1 }
 0x3e8   :  { %4675 = vsyncpa [#allocation5], 1 }
 0x3e9   :  { %4677 = vsyncpa [#allocation5 + $0x1], 1 }

</bundles_post_ra>
